<compile_context>
chip_gen: v5e
topology: v5e:2x2
jax: 0.10.0
libtpu: 0.0.40
codegen_flags: <defaults>
</compile_context>

<pallas_src>
import functools

import jax
import jax.numpy as jnp
from jax.experimental import pallas as pl
from jax.experimental.pallas import tpu as pltpu

LEAKY_SLOPE = 0.01          # torch.nn.LeakyReLU default negative_slope
_HEAD_PAD = 128             # pad the 2-wide classifier head to a lane-dense width


def _round_up(v, m):
    return (v + m - 1) // m * m


def _leaky(y):
    return jnp.where(y > 0, y, LEAKY_SLOPE * y)


_VMEM_LIMIT_CACHE = None


def _vmem_limit():
    """Generation-aware scoped-VMEM budget: 75% of physical, capped at 96 MiB."""
    global _VMEM_LIMIT_CACHE
    if _VMEM_LIMIT_CACHE is None:
        try:
            cap = int(pltpu.get_tpu_info().vmem_capacity_bytes)
        except Exception:
            cap = 64 * 1024 * 1024          # conservative (v7x-sized) fallback
        _VMEM_LIMIT_CACHE = min(96 * 1024 * 1024, (cap * 3) // 4)
    return _VMEM_LIMIT_CACHE


def _choose_tiles(n):
    """(padded_n, row_tile tm, contraction_tile tk) for the RGCN grid."""
    if n <= 512:
        n_pad = _round_up(max(n, 128), 128)
        return n_pad, n_pad, n_pad          # whole (small) graph in one block
    tm, tk = 512, 1024                      # adj tile int8 = 512 KiB
    return _round_up(n, tk), tm, tk


def _row_tile(n):
    """(padded_rows, row_tile) for the input-stage encoders."""
    if n <= 512:
        t = _round_up(max(n, 8), 8)
        return t, t
    return _round_up(n, 256), 256


# ----------------------------------------------------------------------------
# Fused input stage: one 2-layer MLP kernel shared by users and tweets.
#   users : h = leaky(concat(des,num,cat) @ W_blockdiag + b_blk)   (== per-part
#           Linear+LeakyReLU+concat); x = leaky(h @ W_in + b_in)
#   tweets: h = leaky(tweet @ W_t + b_t); x = leaky(h @ W_in + b_in)
# ----------------------------------------------------------------------------
def _mlp2_kernel(x_ref, w1_ref, b1_ref, w2_ref, b2_ref, o_ref):
    h = _leaky(jnp.dot(x_ref[...].astype(jnp.bfloat16), w1_ref[...],
                       preferred_element_type=jnp.float32) + b1_ref[...])
    y = jnp.dot(h.astype(jnp.bfloat16), w2_ref[...],
                preferred_element_type=jnp.float32) + b2_ref[...]
    o_ref[...] = _leaky(y).astype(o_ref.dtype)


def _encode(x, w1_bf16, b1_f32, w2_bf16, b2_f32):
    n = x.shape[0]
    n_rows, tmu = _row_tile(n)
    if n_rows != n:
        x = jnp.pad(x, ((0, n_rows - n), (0, 0)))
    k_in = x.shape[1]
    d_mid = w1_bf16.shape[1]
    d_out = w2_bf16.shape[1]
    out = pl.pallas_call(
        _mlp2_kernel,
        out_shape=jax.ShapeDtypeStruct((n_rows, d_out), jnp.bfloat16),
        grid_spec=pltpu.PrefetchScalarGridSpec(
            num_scalar_prefetch=0,
            grid=(n_rows // tmu,),
            in_specs=[
                pl.BlockSpec((tmu, k_in), lambda i: (i, 0)),
                pl.BlockSpec((k_in, d_mid), lambda i: (0, 0)),
                pl.BlockSpec((1, d_mid), lambda i: (0, 0)),
                pl.BlockSpec((d_mid, d_out), lambda i: (0, 0)),
                pl.BlockSpec((1, d_out), lambda i: (0, 0)),
            ],
            out_specs=pl.BlockSpec((tmu, d_out), lambda i: (i, 0)),
        ),
        compiler_params=pltpu.CompilerParams(
            dimension_semantics=("parallel",),
            vmem_limit_bytes=_vmem_limit()),
    )(x, w1_bf16, b1_f32, w2_bf16, b2_f32)
    return out[:n]


# ----------------------------------------------------------------------------
# Per-relation projection: one wide matmul x @ [W_0 | W_1 | ...] (N = R*d),
# split into Y[r] = x @ W_r at the store.  Output (R, n_pad, d) bf16.
# ----------------------------------------------------------------------------
def _rel_proj_kernel(x_ref, w_ref, y_ref, *, d, num_relations):
    y = jnp.dot(x_ref[...], w_ref[...], preferred_element_type=jnp.float32)
    for r in range(num_relations):
        y_ref[r, :, :] = y[:, r * d:(r + 1) * d].astype(y_ref.dtype)


def _rel_projection(x_bf16, w_all_bf16, num_relations, *, tm):
    n_pad, d = x_bf16.shape
    return pl.pallas_call(
        functools.partial(_rel_proj_kernel, d=d, num_relations=num_relations),
        out_shape=jax.ShapeDtypeStruct((num_relations, n_pad, d), jnp.bfloat16),
        grid_spec=pltpu.PrefetchScalarGridSpec(
            num_scalar_prefetch=0,
            grid=(n_pad // tm,),
            in_specs=[
                pl.BlockSpec((tm, d), lambda i: (i, 0)),
                pl.BlockSpec((d, num_relations * d), lambda i: (0, 0)),
            ],
            out_specs=pl.BlockSpec((num_relations, tm, d), lambda i: (0, i, 0)),
        ),
        compiler_params=pltpu.CompilerParams(
            dimension_semantics=("parallel",),
            vmem_limit_bytes=_vmem_limit()),
    )(x_bf16, w_all_bf16)


# ----------------------------------------------------------------------------
# Tiled RGCN layer (PyG semantics, aggr='mean', root weight, bias):
#   out_i = sum_r inv_deg[r,i] * (counts[r] @ (x @ W_r))_i + x @ W_root + bias
# grid = (row tiles i [parallel], relation r, contraction tiles k);
# adjacency streamed as int8 counts; Y is VMEM-resident; f32 accumulators in
# scratch; optional fused head epilogue (out1 Linear + LeakyReLU + out2).
# ----------------------------------------------------------------------------
def _rgcn_accumulate(x_ref, adj_ref, y_ref, invdeg_ref, wroot_ref, b_ref,
                     acc_ref, part_ref, *, tk):
    r = pl.program_id(1)
    k = pl.program_id(2)
    nk = pl.num_programs(2)

    @pl.when(jnp.logical_and(r == 0, k == 0))
    def _():
        acc_ref[...] = (jnp.dot(x_ref[...], wroot_ref[...],
                                preferred_element_type=jnp.float32)
                        + b_ref[...])

    @pl.when(k == 0)
    def _():
        part_ref[...] = jnp.zeros_like(part_ref)

    kk = pl.multiple_of(k * tk, tk)
    y_tile = y_ref[r, pl.ds(kk, tk), :]                 # VMEM-resident Y slice
    part_ref[...] += jnp.dot(adj_ref[...].astype(jnp.bfloat16), y_tile,
                             preferred_element_type=jnp.float32)

    @pl.when(k == nk - 1)
    def _():
        acc_ref[...] += invdeg_ref[...] * part_ref[...]   # fold 1/deg (mean aggr)

    return jnp.logical_and(r == pl.num_programs(1) - 1, k == nk - 1)


def _rgcn_kernel(x_ref, adj_ref, y_ref, invdeg_ref, wroot_ref, b_ref,
                 o_ref, acc_ref, part_ref, *, tk):
    is_last = _rgcn_accumulate(x_ref, adj_ref, y_ref, invdeg_ref, wroot_ref,
                               b_ref, acc_ref, part_ref, tk=tk)

    @pl.when(is_last)
    def _():
        o_ref[...] = acc_ref[...].astype(o_ref.dtype)


def _rgcn_head_kernel(x_ref, adj_ref, y_ref, invdeg_ref, wroot_ref, b_ref,
                      w1_ref, b1_ref, w2_ref, b2_ref,
                      o_ref, acc_ref, part_ref, *, tk):
    is_last = _rgcn_accumulate(x_ref, adj_ref, y_ref, invdeg_ref, wroot_ref,
                               b_ref, acc_ref, part_ref, tk=tk)

    @pl.when(is_last)
    def _():
        h = acc_ref[...].astype(jnp.bfloat16)            # rgcn2 output (no act.)
        z = jnp.dot(h, w1_ref[...], preferred_element_type=jnp.float32) + b1_ref[...]
        z = _leaky(z).astype(jnp.bfloat16)               # out1 Linear + LeakyReLU
        z = jnp.dot(z, w2_ref[...], preferred_element_type=jnp.float32) + b2_ref[...]
        o_ref[...] = z.astype(o_ref.dtype)               # out2 (padded, no act.)


def rgcn_layer(x_bf16, adj_i8, inv_deg, w_all_bf16, w_root_bf16, b_f32,
               *, head, tm, tk, out_dtype, num_relations):
    n_pad, d = x_bf16.shape

    # Hoist x @ W_r out of the adjacency-tile loop (one wide matmul per layer).
    # TODO(synk): for n_pad large enough that (R, n_pad, d) bf16 no longer fits
    # VMEM, fall back to streaming Y via a blocked (tk, d) BlockSpec.
    y = _rel_projection(x_bf16, w_all_bf16, num_relations, tm=tm)

    grid = (n_pad // tm, num_relations, n_pad // tk)

    in_specs = [
        pl.BlockSpec((tm, d), lambda i, r, k: (i, 0)),                   # x (root)
        pl.BlockSpec((None, tm, tk), lambda i, r, k: (r, i, k)),         # adj int8
        pl.BlockSpec((num_relations, n_pad, d), lambda i, r, k: (0, 0, 0)),  # Y (VMEM-resident)
        pl.BlockSpec((None, tm, 1), lambda i, r, k: (r, i, 0)),          # 1/deg
        pl.BlockSpec((d, d), lambda i, r, k: (0, 0)),                    # W_root
        pl.BlockSpec((1, d), lambda i, r, k: (0, 0)),                    # bias
    ]
    args = [x_bf16, adj_i8, y, inv_deg, w_root_bf16, b_f32.reshape(1, d)]

    if head is None:
        kernel = functools.partial(_rgcn_kernel, tk=tk)
        d_out = d
    else:
        w1, b1, w2p, b2p = head
        d_out = w2p.shape[1]
        kernel = functools.partial(_rgcn_head_kernel, tk=tk)
        in_specs += [
            pl.BlockSpec((d, d), lambda i, r, k: (0, 0)),                # W_out1
            pl.BlockSpec((1, d), lambda i, r, k: (0, 0)),                # b_out1
            pl.BlockSpec((d, d_out), lambda i, r, k: (0, 0)),            # W_out2 (padded)
            pl.BlockSpec((1, d_out), lambda i, r, k: (0, 0)),            # b_out2 (padded)
        ]
        args += [w1, b1.reshape(1, d), w2p, b2p.reshape(1, d_out)]

    return pl.pallas_call(
        kernel,
        out_shape=jax.ShapeDtypeStruct((n_pad, d_out), out_dtype),
        grid_spec=pltpu.PrefetchScalarGridSpec(
            num_scalar_prefetch=0,
            grid=grid,
            in_specs=in_specs,
            out_specs=pl.BlockSpec((tm, d_out), lambda i, r, k: (i, 0)),
            scratch_shapes=[pltpu.VMEM((tm, d), jnp.float32),   # total accumulator
                            pltpu.VMEM((tm, d), jnp.float32)],  # per-relation partial
        ),
        compiler_params=pltpu.CompilerParams(
            dimension_semantics=("parallel", "arbitrary", "arbitrary"),
            vmem_limit_bytes=_vmem_limit()),
    )(*args)


# ----------------------------------------------------------------------------
# Glue: parameters, adjacency construction, forward pass
# ----------------------------------------------------------------------------
def _init_linear(key, d_in, d_out):
    kw, kb = jax.random.split(key)
    scale = 1.0 / jnp.sqrt(jnp.float32(d_in))
    w = jax.random.uniform(kw, (d_in, d_out), jnp.float32, -scale, scale)
    b = jax.random.uniform(kb, (d_out,), jnp.float32, -scale, scale)
    return w, b


def _init_rgcn(key, d, num_relations):
    k1, k2, k3 = jax.random.split(key, 3)
    scale = 1.0 / jnp.sqrt(jnp.float32(d))
    w_rel = jax.random.uniform(k1, (num_relations, d, d), jnp.float32, -scale, scale)
    w_root = jax.random.uniform(k2, (d, d), jnp.float32, -scale, scale)
    b = jax.random.uniform(k3, (d,), jnp.float32, -scale, scale)
    return w_rel, w_root, b


def init_params(key, des_size, tweet_size, num_prop_size, cat_prop_size,
                embedding_dimension, num_relations):
    assert embedding_dimension % 4 == 0
    d_des = embedding_dimension // 2
    d_num = embedding_dimension // 4
    d_cat = embedding_dimension // 4
    keys = jax.random.split(key, 9)
    return {
        "des":   _init_linear(keys[0], des_size, d_des),
        "num":   _init_linear(keys[1], num_prop_size, d_num),
        "cat":   _init_linear(keys[2], cat_prop_size, d_cat),
        "tweet": _init_linear(keys[3], tweet_size, embedding_dimension),
        "input": _init_linear(keys[4], embedding_dimension, embedding_dimension),
        "rgcn1": _init_rgcn(keys[5], embedding_dimension, num_relations),
        "rgcn2": _init_rgcn(keys[6], embedding_dimension, num_relations),
        "out1":  _init_linear(keys[7], embedding_dimension, embedding_dimension),
        "out2":  _init_linear(keys[8], embedding_dimension, 2),
    }


def _prep_head(out1, out2, pad_to=_HEAD_PAD):
    w1, b1 = out1
    w2, b2 = out2
    pad = pad_to - w2.shape[1]
    w2p = jnp.pad(w2, ((0, 0), (0, pad)))
    b2p = jnp.pad(b2, (0, pad))
    return (w1.astype(jnp.bfloat16), b1, w2p.astype(jnp.bfloat16), b2p)


def build_adj(edge_index, edge_type, num_nodes_padded, num_relations):
    """int8 edge counts (j->i of type r) + per-(relation,row) 1/deg (mean aggr)."""
    src, dst = edge_index[0], edge_index[1]
    counts = jnp.zeros((num_relations, num_nodes_padded, num_nodes_padded), jnp.int8)
    counts = counts.at[edge_type, dst, src].add(jnp.int8(1))
    seg = edge_type.astype(jnp.int32) * num_nodes_padded + dst.astype(jnp.int32)
    deg = jax.ops.segment_sum(jnp.ones(edge_type.shape, jnp.float32), seg,
                              num_segments=num_relations * num_nodes_padded)
    inv_deg = (1.0 / jnp.maximum(deg, 1.0)).reshape(num_relations, num_nodes_padded, 1)
    return counts, inv_deg


def tweet_augmented_rgcn_forward(params, des, tweet, num_prop, cat_prop,
                                 edge_index, edge_type, num_relations=2):
    d = params["input"][0].shape[1]

    # --- fused input stage -------------------------------------------------
    wd, bd = params["des"]
    wn, bn = params["num"]
    wc, bc = params["cat"]
    kd, kn, kc = wd.shape[0], wn.shape[0], wc.shape[0]
    dd, dn, dc = wd.shape[1], wn.shape[1], wc.shape[1]
    # Block-diagonal weight == (des|num|cat) per-part Linear + concat, exactly.
    wblk = jnp.zeros((kd + kn + kc, dd + dn + dc), jnp.float32)
    wblk = wblk.at[:kd, :dd].set(wd)
    wblk = wblk.at[kd:kd + kn, dd:dd + dn].set(wn)
    wblk = wblk.at[kd + kn:, dd + dn:].set(wc)
    bblk = jnp.concatenate([bd, bn, bc]).reshape(1, -1)

    win, bin_ = params["input"]
    win_bf = win.astype(jnp.bfloat16)
    bin_r = bin_.reshape(1, -1)

    u = jnp.concatenate([des, num_prop, cat_prop], axis=1)
    x_user = _encode(u, wblk.astype(jnp.bfloat16), bblk, win_bf, bin_r)

    wt, bt = params["tweet"]
    x_tweet = _encode(tweet.astype(jnp.float32), wt.astype(jnp.bfloat16),
                      bt.reshape(1, -1), win_bf, bin_r)

    x = jnp.concatenate([x_user, x_tweet], axis=0)                 # [N, d] bf16

    # --- RGCN stage ----------------------------------------------------------
    n_nodes = x.shape[0]
    n_pad, tm, tk = _choose_tiles(n_nodes)
    if n_pad != n_nodes:
        x = jnp.pad(x, ((0, n_pad - n_nodes), (0, 0)))

    # TODO(synk): dense adjacency is O(R*N^2); replace with a scalar-prefetch CSR
    # gather path for production-scale graphs.
    adj_i8, inv_deg = build_adj(edge_index, edge_type, n_pad, num_relations)

    def prep_rgcn(p):
        w_rel, w_root, b = p
        w_all = jnp.transpose(w_rel, (1, 0, 2)).reshape(
            d, num_relations * d).astype(jnp.bfloat16)
        return w_all, w_root.astype(jnp.bfloat16), b

    w_all1, w_root1, b1 = prep_rgcn(params["rgcn1"])
    w_all2, w_root2, b2 = prep_rgcn(params["rgcn2"])

    x = rgcn_layer(x, adj_i8, inv_deg, w_all1, w_root1, b1, head=None,
                   tm=tm, tk=tk, out_dtype=jnp.bfloat16,
                   num_relations=num_relations)
    # TODO(synk): F.dropout(p=0.3, training=True) is stochastic; inference
    # behavior (identity) is implemented here.
    head = _prep_head(params["out1"], params["out2"])
    logits_padded = rgcn_layer(x, adj_i8, inv_deg, w_all2, w_root2, b2, head=head,
                               tm=tm, tk=tk, out_dtype=jnp.float32,
                               num_relations=num_relations)        # [n_pad, 128]
    return logits_padded[:n_nodes, :params["out2"][0].shape[1]]    # [N, 2]


if __name__ == "__main__":
    key = jax.random.PRNGKey(0)

    # Small shapes consistent with the module defaults (embedding_dimension=128).
    EMB = 128
    DES_SIZE = 100
    TWEET_SIZE = 100
    NUM_PROP_SIZE = 6
    CAT_PROP_SIZE = 11
    NUM_REL = 2
    N_USER = 8
    N_TWEET = 8
    N_NODES = N_USER + N_TWEET
    E = 24

    keys = jax.random.split(key, 9)
    params = init_params(keys[0], DES_SIZE, TWEET_SIZE, NUM_PROP_SIZE,
                         CAT_PROP_SIZE, EMB, NUM_REL)

    des = jax.random.normal(keys[1], (N_USER, DES_SIZE), jnp.float32)
    tweet = jax.random.normal(keys[2], (N_TWEET, TWEET_SIZE), jnp.float32)
    num_prop = jax.random.normal(keys[3], (N_USER, NUM_PROP_SIZE), jnp.float32)
    cat_prop = jax.random.normal(keys[4], (N_USER, CAT_PROP_SIZE), jnp.float32)

    src = jax.random.randint(keys[5], (E,), 0, N_NODES)
    dst = jax.random.randint(keys[6], (E,), 0, N_NODES)
    edge_index = jnp.stack([src, dst])                          # [2, E]
    edge_type = jax.random.randint(keys[7], (E,), 0, NUM_REL)   # [E]

    fwd = jax.jit(tweet_augmented_rgcn_forward, static_argnames=("num_relations",))
    out = fwd(params, des, tweet, num_prop, cat_prop, edge_index, edge_type,
              num_relations=NUM_REL)
    out = jax.block_until_ready(out)
    assert out.shape == (N_NODES, 2)
    assert out.dtype == jnp.float32
    print("KERNEL_OK")
</pallas_src>

<mosaic_0001>
module attributes {stable_mosaic.version = 11 : i64} {
  func.func @_mlp2_kernel(%arg0: i32, %arg1: memref<8x117xf32, #tpu.memory_space<vmem>>, %arg2: memref<117x128xbf16, #tpu.memory_space<vmem>>, %arg3: memref<1x128xf32, #tpu.memory_space<vmem>>, %arg4: memref<128x128xbf16, #tpu.memory_space<vmem>>, %arg5: memref<1x128xf32, #tpu.memory_space<vmem>>, %arg6: memref<8x128xbf16, #tpu.memory_space<vmem>>) attributes {dimension_semantics = [#tpu.dimension_semantics<parallel>], iteration_bounds = array<i64: 1>, scalar_prefetch = 0 : i64, scratch_operands = 0 : i64, tpu.core_type = #tpu.core_type<tc>, window_params = [{transform_indices = @transform_0, window_bounds = array<i64: 8, 117>}, {pipeline_mode = #tpu.pipeline_mode<synchronous>, transform_indices = @transform_1, window_bounds = array<i64: 117, 128>}, {pipeline_mode = #tpu.pipeline_mode<synchronous>, transform_indices = @transform_2, window_bounds = array<i64: 1, 128>}, {pipeline_mode = #tpu.pipeline_mode<synchronous>, transform_indices = @transform_3, window_bounds = array<i64: 128, 128>}, {pipeline_mode = #tpu.pipeline_mode<synchronous>, transform_indices = @transform_4, window_bounds = array<i64: 1, 128>}, {transform_indices = @transform_5, window_bounds = array<i64: 8, 128>}]} {
    %c0 = arith.constant 0 : index
    %c0_0 = arith.constant 0 : index
    %0 = vector.load %arg1[%c0, %c0_0] : memref<8x117xf32, #tpu.memory_space<vmem>>, vector<8x117xf32>
    %1 = arith.truncf %0 : vector<8x117xf32> to vector<8x117xbf16>
    %c0_1 = arith.constant 0 : index
    %c0_2 = arith.constant 0 : index
    %2 = vector.load %arg2[%c0_1, %c0_2] : memref<117x128xbf16, #tpu.memory_space<vmem>>, vector<117x128xbf16>
    %cst = arith.constant dense<0.000000e+00> : vector<8x128xf32>
    %3 = tpu.matmul %1, %2, %cst {dimension_numbers = #tpu.dot_dimension_numbers<[1], [0], [0], [1], [0, 0, 1, 1], [], []>} : vector<8x117xbf16>, vector<117x128xbf16>, vector<8x128xf32> -> vector<8x128xf32>
    %c0_3 = arith.constant 0 : index
    %c0_4 = arith.constant 0 : index
    %4 = vector.load %arg3[%c0_3, %c0_4] : memref<1x128xf32, #tpu.memory_space<vmem>>, vector<1x128xf32>
    %5 = vector.broadcast %4 : vector<1x128xf32> to vector<8x128xf32>
    %6 = arith.addf %3, %5 : vector<8x128xf32>
    %cst_5 = arith.constant 0.000000e+00 : f32
    %7 = vector.broadcast %cst_5 : f32 to vector<8x128xf32>
    %8 = arith.cmpf ogt, %6, %7 : vector<8x128xf32>
    %cst_6 = arith.constant 0.00999999977 : f32
    %9 = vector.broadcast %cst_6 : f32 to vector<8x128xf32>
    %10 = arith.mulf %9, %6 : vector<8x128xf32>
    %11 = arith.select %8, %6, %10 : vector<8x128xi1>, vector<8x128xf32>
    %12 = arith.truncf %11 : vector<8x128xf32> to vector<8x128xbf16>
    %c0_7 = arith.constant 0 : index
    %c0_8 = arith.constant 0 : index
    %13 = vector.load %arg4[%c0_7, %c0_8] : memref<128x128xbf16, #tpu.memory_space<vmem>>, vector<128x128xbf16>
    %cst_9 = arith.constant dense<0.000000e+00> : vector<8x128xf32>
    %14 = tpu.matmul %12, %13, %cst_9 {dimension_numbers = #tpu.dot_dimension_numbers<[1], [0], [0], [1], [0, 0, 1, 1], [], []>} : vector<8x128xbf16>, vector<128x128xbf16>, vector<8x128xf32> -> vector<8x128xf32>
    %c0_10 = arith.constant 0 : index
    %c0_11 = arith.constant 0 : index
    %15 = vector.load %arg5[%c0_10, %c0_11] : memref<1x128xf32, #tpu.memory_space<vmem>>, vector<1x128xf32>
    %16 = vector.broadcast %15 : vector<1x128xf32> to vector<8x128xf32>
    %17 = arith.addf %14, %16 : vector<8x128xf32>
    %cst_12 = arith.constant 0.000000e+00 : f32
    %18 = vector.broadcast %cst_12 : f32 to vector<8x128xf32>
    %19 = arith.cmpf ogt, %17, %18 : vector<8x128xf32>
    %cst_13 = arith.constant 0.00999999977 : f32
    %20 = vector.broadcast %cst_13 : f32 to vector<8x128xf32>
    %21 = arith.mulf %20, %17 : vector<8x128xf32>
    %22 = arith.select %19, %17, %21 : vector<8x128xi1>, vector<8x128xf32>
    %23 = arith.truncf %22 : vector<8x128xf32> to vector<8x128xbf16>
    %c0_14 = arith.constant 0 : index
    %c0_15 = arith.constant 0 : index
    %24 = vector.load %arg6[%c0_14, %c0_15] : memref<8x128xbf16, #tpu.memory_space<vmem>>, vector<8x128xbf16>
    tpu.vector_store %arg6[%c0_14, %c0_15], %23 {strides = array<i32>} : memref<8x128xbf16, #tpu.memory_space<vmem>>, vector<8x128xbf16>,
    return
  }
  func.func @transform_0(%arg0: i32) -> (i32, i32) {
    %c0_i32 = arith.constant 0 : i32
    %c0_i32_0 = arith.constant 0 : i32
    return %arg0, %c0_i32 : i32, i32
  }
  func.func @transform_1(%arg0: i32) -> (i32, i32) {
    %c0_i32 = arith.constant 0 : i32
    %c0_i32_0 = arith.constant 0 : i32
    %c0_i32_1 = arith.constant 0 : i32
    return %c0_i32, %c0_i32_0 : i32, i32
  }
  func.func @transform_2(%arg0: i32) -> (i32, i32) {
    %c0_i32 = arith.constant 0 : i32
    %c0_i32_0 = arith.constant 0 : i32
    %c0_i32_1 = arith.constant 0 : i32
    return %c0_i32, %c0_i32_0 : i32, i32
  }
  func.func @transform_3(%arg0: i32) -> (i32, i32) {
    %c0_i32 = arith.constant 0 : i32
    %c0_i32_0 = arith.constant 0 : i32
    %c0_i32_1 = arith.constant 0 : i32
    return %c0_i32, %c0_i32_0 : i32, i32
  }
  func.func @transform_4(%arg0: i32) -> (i32, i32) {
    %c0_i32 = arith.constant 0 : i32
    %c0_i32_0 = arith.constant 0 : i32
    %c0_i32_1 = arith.constant 0 : i32
    return %c0_i32, %c0_i32_0 : i32, i32
  }
  func.func @transform_5(%arg0: i32) -> (i32, i32) {
    %c0_i32 = arith.constant 0 : i32
    %c0_i32_0 = arith.constant 0 : i32
    return %arg0, %c0_i32 : i32, i32
  }
}

module attributes {stable_mosaic.version = 11 : i64} {
  func.func @_mlp2_kernel(%arg0: i32, %arg1: memref<8x100xf32, #tpu.memory_space<vmem>>, %arg2: memref<100x128xbf16, #tpu.memory_space<vmem>>, %arg3: memref<1x128xf32, #tpu.memory_space<vmem>>, %arg4: memref<128x128xbf16, #tpu.memory_space<vmem>>, %arg5: memref<1x128xf32, #tpu.memory_space<vmem>>, %arg6: memref<8x128xbf16, #tpu.memory_space<vmem>>) attributes {dimension_semantics = [#tpu.dimension_semantics<parallel>], iteration_bounds = array<i64: 1>, scalar_prefetch = 0 : i64, scratch_operands = 0 : i64, tpu.core_type = #tpu.core_type<tc>, window_params = [{transform_indices = @transform_0, window_bounds = array<i64: 8, 100>}, {pipeline_mode = #tpu.pipeline_mode<synchronous>, transform_indices = @transform_1, window_bounds = array<i64: 100, 128>}, {pipeline_mode = #tpu.pipeline_mode<synchronous>, transform_indices = @transform_2, window_bounds = array<i64: 1, 128>}, {pipeline_mode = #tpu.pipeline_mode<synchronous>, transform_indices = @transform_3, window_bounds = array<i64: 128, 128>}, {pipeline_mode = #tpu.pipeline_mode<synchronous>, transform_indices = @transform_4, window_bounds = array<i64: 1, 128>}, {transform_indices = @transform_5, window_bounds = array<i64: 8, 128>}]} {
    %c0 = arith.constant 0 : index
    %c0_0 = arith.constant 0 : index
    %0 = vector.load %arg1[%c0, %c0_0] : memref<8x100xf32, #tpu.memory_space<vmem>>, vector<8x100xf32>
    %1 = arith.truncf %0 : vector<8x100xf32> to vector<8x100xbf16>
    %c0_1 = arith.constant 0 : index
    %c0_2 = arith.constant 0 : index
    %2 = vector.load %arg2[%c0_1, %c0_2] : memref<100x128xbf16, #tpu.memory_space<vmem>>, vector<100x128xbf16>
    %cst = arith.constant dense<0.000000e+00> : vector<8x128xf32>
    %3 = tpu.matmul %1, %2, %cst {dimension_numbers = #tpu.dot_dimension_numbers<[1], [0], [0], [1], [0, 0, 1, 1], [], []>} : vector<8x100xbf16>, vector<100x128xbf16>, vector<8x128xf32> -> vector<8x128xf32>
    %c0_3 = arith.constant 0 : index
    %c0_4 = arith.constant 0 : index
    %4 = vector.load %arg3[%c0_3, %c0_4] : memref<1x128xf32, #tpu.memory_space<vmem>>, vector<1x128xf32>
    %5 = vector.broadcast %4 : vector<1x128xf32> to vector<8x128xf32>
    %6 = arith.addf %3, %5 : vector<8x128xf32>
    %cst_5 = arith.constant 0.000000e+00 : f32
    %7 = vector.broadcast %cst_5 : f32 to vector<8x128xf32>
    %8 = arith.cmpf ogt, %6, %7 : vector<8x128xf32>
    %cst_6 = arith.constant 0.00999999977 : f32
    %9 = vector.broadcast %cst_6 : f32 to vector<8x128xf32>
    %10 = arith.mulf %9, %6 : vector<8x128xf32>
    %11 = arith.select %8, %6, %10 : vector<8x128xi1>, vector<8x128xf32>
    %12 = arith.truncf %11 : vector<8x128xf32> to vector<8x128xbf16>
    %c0_7 = arith.constant 0 : index
    %c0_8 = arith.constant 0 : index
    %13 = vector.load %arg4[%c0_7, %c0_8] : memref<128x128xbf16, #tpu.memory_space<vmem>>, vector<128x128xbf16>
    %cst_9 = arith.constant dense<0.000000e+00> : vector<8x128xf32>
    %14 = tpu.matmul %12, %13, %cst_9 {dimension_numbers = #tpu.dot_dimension_numbers<[1], [0], [0], [1], [0, 0, 1, 1], [], []>} : vector<8x128xbf16>, vector<128x128xbf16>, vector<8x128xf32> -> vector<8x128xf32>
    %c0_10 = arith.constant 0 : index
    %c0_11 = arith.constant 0 : index
    %15 = vector.load %arg5[%c0_10, %c0_11] : memref<1x128xf32, #tpu.memory_space<vmem>>, vector<1x128xf32>
    %16 = vector.broadcast %15 : vector<1x128xf32> to vector<8x128xf32>
    %17 = arith.addf %14, %16 : vector<8x128xf32>
    %cst_12 = arith.constant 0.000000e+00 : f32
    %18 = vector.broadcast %cst_12 : f32 to vector<8x128xf32>
    %19 = arith.cmpf ogt, %17, %18 : vector<8x128xf32>
    %cst_13 = arith.constant 0.00999999977 : f32
    %20 = vector.broadcast %cst_13 : f32 to vector<8x128xf32>
    %21 = arith.mulf %20, %17 : vector<8x128xf32>
    %22 = arith.select %19, %17, %21 : vector<8x128xi1>, vector<8x128xf32>
    %23 = arith.truncf %22 : vector<8x128xf32> to vector<8x128xbf16>
    %c0_14 = arith.constant 0 : index
    %c0_15 = arith.constant 0 : index
    %24 = vector.load %arg6[%c0_14, %c0_15] : memref<8x128xbf16, #tpu.memory_space<vmem>>, vector<8x128xbf16>
    tpu.vector_store %arg6[%c0_14, %c0_15], %23 {strides = array<i32>} : memref<8x128xbf16, #tpu.memory_space<vmem>>, vector<8x128xbf16>,
    return
  }
  func.func @transform_0(%arg0: i32) -> (i32, i32) {
    %c0_i32 = arith.constant 0 : i32
    %c0_i32_0 = arith.constant 0 : i32
    return %arg0, %c0_i32 : i32, i32
  }
  func.func @transform_1(%arg0: i32) -> (i32, i32) {
    %c0_i32 = arith.constant 0 : i32
    %c0_i32_0 = arith.constant 0 : i32
    %c0_i32_1 = arith.constant 0 : i32
    return %c0_i32, %c0_i32_0 : i32, i32
  }
  func.func @transform_2(%arg0: i32) -> (i32, i32) {
    %c0_i32 = arith.constant 0 : i32
    %c0_i32_0 = arith.constant 0 : i32
    %c0_i32_1 = arith.constant 0 : i32
    return %c0_i32, %c0_i32_0 : i32, i32
  }
  func.func @transform_3(%arg0: i32) -> (i32, i32) {
    %c0_i32 = arith.constant 0 : i32
    %c0_i32_0 = arith.constant 0 : i32
    %c0_i32_1 = arith.constant 0 : i32
    return %c0_i32, %c0_i32_0 : i32, i32
  }
  func.func @transform_4(%arg0: i32) -> (i32, i32) {
    %c0_i32 = arith.constant 0 : i32
    %c0_i32_0 = arith.constant 0 : i32
    %c0_i32_1 = arith.constant 0 : i32
    return %c0_i32, %c0_i32_0 : i32, i32
  }
  func.func @transform_5(%arg0: i32) -> (i32, i32) {
    %c0_i32 = arith.constant 0 : i32
    %c0_i32_0 = arith.constant 0 : i32
    return %arg0, %c0_i32 : i32, i32
  }
}

module attributes {stable_mosaic.version = 11 : i64} {
  func.func @_rel_proj_kernel(%arg0: i32, %arg1: memref<128x128xbf16, #tpu.memory_space<vmem>>, %arg2: memref<128x256xbf16, #tpu.memory_space<vmem>>, %arg3: memref<2x128x128xbf16, #tpu.memory_space<vmem>>) attributes {dimension_semantics = [#tpu.dimension_semantics<parallel>], iteration_bounds = array<i64: 1>, scalar_prefetch = 0 : i64, scratch_operands = 0 : i64, tpu.core_type = #tpu.core_type<tc>, window_params = [{transform_indices = @transform_0, window_bounds = array<i64: 128, 128>}, {pipeline_mode = #tpu.pipeline_mode<synchronous>, transform_indices = @transform_1, window_bounds = array<i64: 128, 256>}, {transform_indices = @transform_2, window_bounds = array<i64: 2, 128, 128>}]} {
    %c0 = arith.constant 0 : index
    %c0_0 = arith.constant 0 : index
    %0 = vector.load %arg1[%c0, %c0_0] : memref<128x128xbf16, #tpu.memory_space<vmem>>, vector<128x128xbf16>
    %c0_1 = arith.constant 0 : index
    %c0_2 = arith.constant 0 : index
    %1 = vector.load %arg2[%c0_1, %c0_2] : memref<128x256xbf16, #tpu.memory_space<vmem>>, vector<128x256xbf16>
    %cst = arith.constant dense<0.000000e+00> : vector<128x256xf32>
    %2 = tpu.matmul %0, %1, %cst {dimension_numbers = #tpu.dot_dimension_numbers<[1], [0], [0], [1], [0, 0, 1, 1], [], []>} : vector<128x128xbf16>, vector<128x256xbf16>, vector<128x256xf32> -> vector<128x256xf32>
    %3 = vector.extract_strided_slice %2 {offsets = [0, 0], sizes = [128, 128], strides = [1, 1]} : vector<128x256xf32> to vector<128x128xf32>
    %4 = arith.truncf %3 : vector<128x128xf32> to vector<128x128xbf16>
    %c0_3 = arith.constant 0 : index
    %c0_4 = arith.constant 0 : index
    %c0_5 = arith.constant 0 : index
    %5 = vector.load %arg3[%c0_3, %c0_4, %c0_5] : memref<2x128x128xbf16, #tpu.memory_space<vmem>>, vector<1x128x128xbf16>
    %6 = vector.shape_cast %5 : vector<1x128x128xbf16> to vector<128x128xbf16>
    %7 = vector.shape_cast %4 : vector<128x128xbf16> to vector<1x128x128xbf16>
    tpu.vector_store %arg3[%c0_3, %c0_4, %c0_5], %7 {strides = array<i32>} : memref<2x128x128xbf16, #tpu.memory_space<vmem>>, vector<1x128x128xbf16>,
    %8 = vector.extract_strided_slice %2 {offsets = [0, 128], sizes = [128, 128], strides = [1, 1]} : vector<128x256xf32> to vector<128x128xf32>
    %9 = arith.truncf %8 : vector<128x128xf32> to vector<128x128xbf16>
    %c1 = arith.constant 1 : index
    %c0_6 = arith.constant 0 : index
    %c0_7 = arith.constant 0 : index
    %10 = vector.load %arg3[%c1, %c0_6, %c0_7] : memref<2x128x128xbf16, #tpu.memory_space<vmem>>, vector<1x128x128xbf16>
    %11 = vector.shape_cast %10 : vector<1x128x128xbf16> to vector<128x128xbf16>
    %12 = vector.shape_cast %9 : vector<128x128xbf16> to vector<1x128x128xbf16>
    tpu.vector_store %arg3[%c1, %c0_6, %c0_7], %12 {strides = array<i32>} : memref<2x128x128xbf16, #tpu.memory_space<vmem>>, vector<1x128x128xbf16>,
    return
  }
  func.func @transform_0(%arg0: i32) -> (i32, i32) {
    %c0_i32 = arith.constant 0 : i32
    %c0_i32_0 = arith.constant 0 : i32
    return %arg0, %c0_i32 : i32, i32
  }
  func.func @transform_1(%arg0: i32) -> (i32, i32) {
    %c0_i32 = arith.constant 0 : i32
    %c0_i32_0 = arith.constant 0 : i32
    %c0_i32_1 = arith.constant 0 : i32
    return %c0_i32, %c0_i32_0 : i32, i32
  }
  func.func @transform_2(%arg0: i32) -> (i32, i32, i32) {
    %c0_i32 = arith.constant 0 : i32
    %c0_i32_0 = arith.constant 0 : i32
    %c0_i32_1 = arith.constant 0 : i32
    return %c0_i32, %arg0, %c0_i32_0 : i32, i32, i32
  }
}

module attributes {stable_mosaic.version = 11 : i64} {
  func.func @_rgcn_kernel(%arg0: i32, %arg1: i32, %arg2: i32, %arg3: memref<128x128xbf16, #tpu.memory_space<vmem>>, %arg4: memref<1x128x128xi8, #tpu.memory_space<vmem>>, %arg5: memref<2x128x128xbf16, #tpu.memory_space<vmem>>, %arg6: memref<1x128x1xf32, #tpu.memory_space<vmem>>, %arg7: memref<128x128xbf16, #tpu.memory_space<vmem>>, %arg8: memref<1x128xf32, #tpu.memory_space<vmem>>, %arg9: memref<128x128xbf16, #tpu.memory_space<vmem>>, %arg10: memref<128x128xf32, #tpu.memory_space<vmem>>, %arg11: memref<128x128xf32, #tpu.memory_space<vmem>>) attributes {dimension_semantics = [#tpu.dimension_semantics<parallel>, #tpu.dimension_semantics<arbitrary>, #tpu.dimension_semantics<arbitrary>], iteration_bounds = array<i64: 1, 2, 1>, scalar_prefetch = 0 : i64, scratch_operands = 2 : i64, tpu.core_type = #tpu.core_type<tc>, window_params = [{transform_indices = @transform_0, window_bounds = array<i64: 128, 128>}, {transform_indices = @transform_1, window_bounds = array<i64: 1, 128, 128>}, {pipeline_mode = #tpu.pipeline_mode<synchronous>, transform_indices = @transform_2, window_bounds = array<i64: 2, 128, 128>}, {transform_indices = @transform_3, window_bounds = array<i64: 1, 128, 1>}, {pipeline_mode = #tpu.pipeline_mode<synchronous>, transform_indices = @transform_4, window_bounds = array<i64: 128, 128>}, {pipeline_mode = #tpu.pipeline_mode<synchronous>, transform_indices = @transform_5, window_bounds = array<i64: 1, 128>}, {transform_indices = @transform_6, window_bounds = array<i64: 128, 128>}]} {
    %c0_i32 = arith.constant 0 : i32
    %0 = arith.cmpi eq, %arg1, %c0_i32 : i32
    %c0_i32_0 = arith.constant 0 : i32
    %1 = arith.cmpi eq, %arg2, %c0_i32_0 : i32
    %2 = arith.andi %0, %1 : i1
    %3 = arith.extui %2 : i1 to i32
    %c0_i32_1 = arith.constant 0 : i32
    %4 = arith.cmpi ne, %3, %c0_i32_1 : i32
    scf.if %4 {
      %c0_15 = arith.constant 0 : index
      %c0_16 = arith.constant 0 : index
      %29 = vector.load %arg3[%c0_15, %c0_16] : memref<128x128xbf16, #tpu.memory_space<vmem>>, vector<128x128xbf16>
      %c0_17 = arith.constant 0 : index
      %c0_18 = arith.constant 0 : index
      %30 = vector.load %arg7[%c0_17, %c0_18] : memref<128x128xbf16, #tpu.memory_space<vmem>>, vector<128x128xbf16>
      %cst_19 = arith.constant dense<0.000000e+00> : vector<128x128xf32>
      %31 = tpu.matmul %29, %30, %cst_19 {dimension_numbers = #tpu.dot_dimension_numbers<[1], [0], [0], [1], [0, 0, 1, 1], [], []>} : vector<128x128xbf16>, vector<128x128xbf16>, vector<128x128xf32> -> vector<128x128xf32>
      %c0_20 = arith.constant 0 : index
      %c0_21 = arith.constant 0 : index
      %32 = vector.load %arg8[%c0_20, %c0_21] : memref<1x128xf32, #tpu.memory_space<vmem>>, vector<1x128xf32>
      %33 = vector.broadcast %32 : vector<1x128xf32> to vector<128x128xf32>
      %34 = arith.addf %31, %33 : vector<128x128xf32>
      %c0_22 = arith.constant 0 : index
      %c0_23 = arith.constant 0 : index
      %35 = vector.load %arg10[%c0_22, %c0_23] : memref<128x128xf32, #tpu.memory_space<vmem>>, vector<128x128xf32>
      tpu.vector_store %arg10[%c0_22, %c0_23], %34 {strides = array<i32>} : memref<128x128xf32, #tpu.memory_space<vmem>>, vector<128x128xf32>,
    } else {
    }
    %c0_i32_2 = arith.constant 0 : i32
    %5 = arith.cmpi eq, %arg2, %c0_i32_2 : i32
    %6 = arith.extui %5 : i1 to i32
    %c0_i32_3 = arith.constant 0 : i32
    %7 = arith.cmpi ne, %6, %c0_i32_3 : i32
    scf.if %7 {
      %cst_15 = arith.constant 0.000000e+00 : f32
      %29 = vector.broadcast %cst_15 : f32 to vector<128x128xf32>
      %c0_16 = arith.constant 0 : index
      %c0_17 = arith.constant 0 : index
      %30 = vector.load %arg11[%c0_16, %c0_17] : memref<128x128xf32, #tpu.memory_space<vmem>>, vector<128x128xf32>
      tpu.vector_store %arg11[%c0_16, %c0_17], %29 {strides = array<i32>} : memref<128x128xf32, #tpu.memory_space<vmem>>, vector<128x128xf32>,
    } else {
    }
    %c128_i32 = arith.constant 128 : i32
    %8 = arith.muli %arg2, %c128_i32 : i32
    %9 = tpu.assume_multiple %8, 128 : i32
    %10 = arith.index_cast %arg1 : i32 to index
    %11 = arith.index_cast %9 : i32 to index
    %c0 = arith.constant 0 : index
    %12 = vector.load %arg5[%10, %11, %c0] : memref<2x128x128xbf16, #tpu.memory_space<vmem>>, vector<1x128x128xbf16>
    %13 = vector.shape_cast %12 : vector<1x128x128xbf16> to vector<128x128xbf16>
    %c0_4 = arith.constant 0 : index
    %c0_5 = arith.constant 0 : index
    %14 = vector.load %arg11[%c0_4, %c0_5] : memref<128x128xf32, #tpu.memory_space<vmem>>, vector<128x128xf32>
    %c0_6 = arith.constant 0 : index
    %c0_7 = arith.constant 0 : index
    %c0_8 = arith.constant 0 : index
    %15 = vector.load %arg4[%c0_6, %c0_7, %c0_8] : memref<1x128x128xi8, #tpu.memory_space<vmem>>, vector<1x128x128xi8>
    %16 = vector.shape_cast %15 : vector<1x128x128xi8> to vector<128x128xi8>
    %17 = arith.sitofp %16 : vector<128x128xi8> to vector<128x128xbf16>
    %cst = arith.constant dense<0.000000e+00> : vector<128x128xf32>
    %18 = tpu.matmul %17, %13, %cst {dimension_numbers = #tpu.dot_dimension_numbers<[1], [0], [0], [1], [0, 0, 1, 1], [], []>} : vector<128x128xbf16>, vector<128x128xbf16>, vector<128x128xf32> -> vector<128x128xf32>
    %19 = arith.addf %14, %18 : vector<128x128xf32>
    %c0_9 = arith.constant 0 : index
    %c0_10 = arith.constant 0 : index
    %20 = vector.load %arg11[%c0_9, %c0_10] : memref<128x128xf32, #tpu.memory_space<vmem>>, vector<128x128xf32>
    tpu.vector_store %arg11[%c0_9, %c0_10], %19 {strides = array<i32>} : memref<128x128xf32, #tpu.memory_space<vmem>>, vector<128x128xf32>,
    %c0_i32_11 = arith.constant 0 : i32
    %21 = arith.cmpi eq, %arg2, %c0_i32_11 : i32
    %22 = arith.extui %21 : i1 to i32
    %c0_i32_12 = arith.constant 0 : i32
    %23 = arith.cmpi ne, %22, %c0_i32_12 : i32
    scf.if %23 {
      %c0_15 = arith.constant 0 : index
      %c0_16 = arith.constant 0 : index
      %29 = vector.load %arg10[%c0_15, %c0_16] : memref<128x128xf32, #tpu.memory_space<vmem>>, vector<128x128xf32>
      %c0_17 = arith.constant 0 : index
      %c0_18 = arith.constant 0 : index
      %c0_19 = arith.constant 0 : index
      %30 = vector.load %arg6[%c0_17, %c0_18, %c0_19] : memref<1x128x1xf32, #tpu.memory_space<vmem>>, vector<1x128x1xf32>
      %31 = vector.shape_cast %30 : vector<1x128x1xf32> to vector<128x1xf32>
      %c0_20 = arith.constant 0 : index
      %c0_21 = arith.constant 0 : index
      %32 = vector.load %arg11[%c0_20, %c0_21] : memref<128x128xf32, #tpu.memory_space<vmem>>, vector<128x128xf32>
      %33 = vector.broadcast %31 : vector<128x1xf32> to vector<128x128xf32>
      %34 = arith.mulf %33, %32 : vector<128x128xf32>
      %35 = arith.addf %29, %34 : vector<128x128xf32>
      %c0_22 = arith.constant 0 : index
      %c0_23 = arith.constant 0 : index
      %36 = vector.load %arg10[%c0_22, %c0_23] : memref<128x128xf32, #tpu.memory_space<vmem>>, vector<128x128xf32>
      tpu.vector_store %arg10[%c0_22, %c0_23], %35 {strides = array<i32>} : memref<128x128xf32, #tpu.memory_space<vmem>>, vector<128x128xf32>,
    } else {
    }
    %c1_i32 = arith.constant 1 : i32
    %24 = arith.cmpi eq, %arg1, %c1_i32 : i32
    %c0_i32_13 = arith.constant 0 : i32
    %25 = arith.cmpi eq, %arg2, %c0_i32_13 : i32
    %26 = arith.andi %24, %25 : i1
    %27 = arith.extui %26 : i1 to i32
    %c0_i32_14 = arith.constant 0 : i32
    %28 = arith.cmpi ne, %27, %c0_i32_14 : i32
    scf.if %28 {
      %c0_15 = arith.constant 0 : index
      %c0_16 = arith.constant 0 : index
      %29 = vector.load %arg10[%c0_15, %c0_16] : memref<128x128xf32, #tpu.memory_space<vmem>>, vector<128x128xf32>
      %30 = arith.truncf %29 : vector<128x128xf32> to vector<128x128xbf16>
      %c0_17 = arith.constant 0 : index
      %c0_18 = arith.constant 0 : index
      %31 = vector.load %arg9[%c0_17, %c0_18] : memref<128x128xbf16, #tpu.memory_space<vmem>>, vector<128x128xbf16>
      tpu.vector_store %arg9[%c0_17, %c0_18], %30 {strides = array<i32>} : memref<128x128xbf16, #tpu.memory_space<vmem>>, vector<128x128xbf16>,
    } else {
    }
    return
  }
  func.func @transform_0(%arg0: i32, %arg1: i32, %arg2: i32) -> (i32, i32) {
    %c0_i32 = arith.constant 0 : i32
    %c0_i32_0 = arith.constant 0 : i32
    return %arg0, %c0_i32 : i32, i32
  }
  func.func @transform_1(%arg0: i32, %arg1: i32, %arg2: i32) -> (i32, i32, i32) {
    %c0_i32 = arith.constant 0 : i32
    return %arg1, %arg0, %arg2 : i32, i32, i32
  }
  func.func @transform_2(%arg0: i32, %arg1: i32, %arg2: i32) -> (i32, i32, i32) {
    %c0_i32 = arith.constant 0 : i32
    %c0_i32_0 = arith.constant 0 : i32
    %c0_i32_1 = arith.constant 0 : i32
    %c0_i32_2 = arith.constant 0 : i32
    return %c0_i32, %c0_i32_0, %c0_i32_1 : i32, i32, i32
  }
  func.func @transform_3(%arg0: i32, %arg1: i32, %arg2: i32) -> (i32, i32, i32) {
    %c0_i32 = arith.constant 0 : i32
    %c0_i32_0 = arith.constant 0 : i32
    return %arg1, %arg0, %c0_i32 : i32, i32, i32
  }
  func.func @transform_4(%arg0: i32, %arg1: i32, %arg2: i32) -> (i32, i32) {
    %c0_i32 = arith.constant 0 : i32
    %c0_i32_0 = arith.constant 0 : i32
    %c0_i32_1 = arith.constant 0 : i32
    return %c0_i32, %c0_i32_0 : i32, i32
  }
  func.func @transform_5(%arg0: i32, %arg1: i32, %arg2: i32) -> (i32, i32) {
    %c0_i32 = arith.constant 0 : i32
    %c0_i32_0 = arith.constant 0 : i32
    %c0_i32_1 = arith.constant 0 : i32
    return %c0_i32, %c0_i32_0 : i32, i32
  }
  func.func @transform_6(%arg0: i32, %arg1: i32, %arg2: i32) -> (i32, i32) {
    %c0_i32 = arith.constant 0 : i32
    %c0_i32_0 = arith.constant 0 : i32
    return %arg0, %c0_i32 : i32, i32
  }
}

module attributes {stable_mosaic.version = 11 : i64} {
  func.func @_rgcn_head_kernel(%arg0: i32, %arg1: i32, %arg2: i32, %arg3: memref<128x128xbf16, #tpu.memory_space<vmem>>, %arg4: memref<1x128x128xi8, #tpu.memory_space<vmem>>, %arg5: memref<2x128x128xbf16, #tpu.memory_space<vmem>>, %arg6: memref<1x128x1xf32, #tpu.memory_space<vmem>>, %arg7: memref<128x128xbf16, #tpu.memory_space<vmem>>, %arg8: memref<1x128xf32, #tpu.memory_space<vmem>>, %arg9: memref<128x128xbf16, #tpu.memory_space<vmem>>, %arg10: memref<1x128xf32, #tpu.memory_space<vmem>>, %arg11: memref<128x128xbf16, #tpu.memory_space<vmem>>, %arg12: memref<1x128xf32, #tpu.memory_space<vmem>>, %arg13: memref<128x128xf32, #tpu.memory_space<vmem>>, %arg14: memref<128x128xf32, #tpu.memory_space<vmem>>, %arg15: memref<128x128xf32, #tpu.memory_space<vmem>>) attributes {dimension_semantics = [#tpu.dimension_semantics<parallel>, #tpu.dimension_semantics<arbitrary>, #tpu.dimension_semantics<arbitrary>], iteration_bounds = array<i64: 1, 2, 1>, scalar_prefetch = 0 : i64, scratch_operands = 2 : i64, tpu.core_type = #tpu.core_type<tc>, window_params = [{transform_indices = @transform_0, window_bounds = array<i64: 128, 128>}, {transform_indices = @transform_1, window_bounds = array<i64: 1, 128, 128>}, {pipeline_mode = #tpu.pipeline_mode<synchronous>, transform_indices = @transform_2, window_bounds = array<i64: 2, 128, 128>}, {transform_indices = @transform_3, window_bounds = array<i64: 1, 128, 1>}, {pipeline_mode = #tpu.pipeline_mode<synchronous>, transform_indices = @transform_4, window_bounds = array<i64: 128, 128>}, {pipeline_mode = #tpu.pipeline_mode<synchronous>, transform_indices = @transform_5, window_bounds = array<i64: 1, 128>}, {pipeline_mode = #tpu.pipeline_mode<synchronous>, transform_indices = @transform_6, window_bounds = array<i64: 128, 128>}, {pipeline_mode = #tpu.pipeline_mode<synchronous>, transform_indices = @transform_7, window_bounds = array<i64: 1, 128>}, {pipeline_mode = #tpu.pipeline_mode<synchronous>, transform_indices = @transform_8, window_bounds = array<i64: 128, 128>}, {pipeline_mode = #tpu.pipeline_mode<synchronous>, transform_indices = @transform_9, window_bounds = array<i64: 1, 128>}, {transform_indices = @transform_10, window_bounds = array<i64: 128, 128>}]} {
    %c0_i32 = arith.constant 0 : i32
    %0 = arith.cmpi eq, %arg1, %c0_i32 : i32
    %c0_i32_0 = arith.constant 0 : i32
    %1 = arith.cmpi eq, %arg2, %c0_i32_0 : i32
    %2 = arith.andi %0, %1 : i1
    %3 = arith.extui %2 : i1 to i32
    %c0_i32_1 = arith.constant 0 : i32
    %4 = arith.cmpi ne, %3, %c0_i32_1 : i32
    scf.if %4 {
      %c0_15 = arith.constant 0 : index
      %c0_16 = arith.constant 0 : index
      %29 = vector.load %arg3[%c0_15, %c0_16] : memref<128x128xbf16, #tpu.memory_space<vmem>>, vector<128x128xbf16>
      %c0_17 = arith.constant 0 : index
      %c0_18 = arith.constant 0 : index
      %30 = vector.load %arg7[%c0_17, %c0_18] : memref<128x128xbf16, #tpu.memory_space<vmem>>, vector<128x128xbf16>
      %cst_19 = arith.constant dense<0.000000e+00> : vector<128x128xf32>
      %31 = tpu.matmul %29, %30, %cst_19 {dimension_numbers = #tpu.dot_dimension_numbers<[1], [0], [0], [1], [0, 0, 1, 1], [], []>} : vector<128x128xbf16>, vector<128x128xbf16>, vector<128x128xf32> -> vector<128x128xf32>
      %c0_20 = arith.constant 0 : index
      %c0_21 = arith.constant 0 : index
      %32 = vector.load %arg8[%c0_20, %c0_21] : memref<1x128xf32, #tpu.memory_space<vmem>>, vector<1x128xf32>
      %33 = vector.broadcast %32 : vector<1x128xf32> to vector<128x128xf32>
      %34 = arith.addf %31, %33 : vector<128x128xf32>
      %c0_22 = arith.constant 0 : index
      %c0_23 = arith.constant 0 : index
      %35 = vector.load %arg14[%c0_22, %c0_23] : memref<128x128xf32, #tpu.memory_space<vmem>>, vector<128x128xf32>
      tpu.vector_store %arg14[%c0_22, %c0_23], %34 {strides = array<i32>} : memref<128x128xf32, #tpu.memory_space<vmem>>, vector<128x128xf32>,
    } else {
    }
    %c0_i32_2 = arith.constant 0 : i32
    %5 = arith.cmpi eq, %arg2, %c0_i32_2 : i32
    %6 = arith.extui %5 : i1 to i32
    %c0_i32_3 = arith.constant 0 : i32
    %7 = arith.cmpi ne, %6, %c0_i32_3 : i32
    scf.if %7 {
      %cst_15 = arith.constant 0.000000e+00 : f32
      %29 = vector.broadcast %cst_15 : f32 to vector<128x128xf32>
      %c0_16 = arith.constant 0 : index
      %c0_17 = arith.constant 0 : index
      %30 = vector.load %arg15[%c0_16, %c0_17] : memref<128x128xf32, #tpu.memory_space<vmem>>, vector<128x128xf32>
      tpu.vector_store %arg15[%c0_16, %c0_17], %29 {strides = array<i32>} : memref<128x128xf32, #tpu.memory_space<vmem>>, vector<128x128xf32>,
    } else {
    }
    %c128_i32 = arith.constant 128 : i32
    %8 = arith.muli %arg2, %c128_i32 : i32
    %9 = tpu.assume_multiple %8, 128 : i32
    %10 = arith.index_cast %arg1 : i32 to index
    %11 = arith.index_cast %9 : i32 to index
    %c0 = arith.constant 0 : index
    %12 = vector.load %arg5[%10, %11, %c0] : memref<2x128x128xbf16, #tpu.memory_space<vmem>>, vector<1x128x128xbf16>
    %13 = vector.shape_cast %12 : vector<1x128x128xbf16> to vector<128x128xbf16>
    %c0_4 = arith.constant 0 : index
    %c0_5 = arith.constant 0 : index
    %14 = vector.load %arg15[%c0_4, %c0_5] : memref<128x128xf32, #tpu.memory_space<vmem>>, vector<128x128xf32>
    %c0_6 = arith.constant 0 : index
    %c0_7 = arith.constant 0 : index
    %c0_8 = arith.constant 0 : index
    %15 = vector.load %arg4[%c0_6, %c0_7, %c0_8] : memref<1x128x128xi8, #tpu.memory_space<vmem>>, vector<1x128x128xi8>
    %16 = vector.shape_cast %15 : vector<1x128x128xi8> to vector<128x128xi8>
    %17 = arith.sitofp %16 : vector<128x128xi8> to vector<128x128xbf16>
    %cst = arith.constant dense<0.000000e+00> : vector<128x128xf32>
    %18 = tpu.matmul %17, %13, %cst {dimension_numbers = #tpu.dot_dimension_numbers<[1], [0], [0], [1], [0, 0, 1, 1], [], []>} : vector<128x128xbf16>, vector<128x128xbf16>, vector<128x128xf32> -> vector<128x128xf32>
    %19 = arith.addf %14, %18 : vector<128x128xf32>
    %c0_9 = arith.constant 0 : index
    %c0_10 = arith.constant 0 : index
    %20 = vector.load %arg15[%c0_9, %c0_10] : memref<128x128xf32, #tpu.memory_space<vmem>>, vector<128x128xf32>
    tpu.vector_store %arg15[%c0_9, %c0_10], %19 {strides = array<i32>} : memref<128x128xf32, #tpu.memory_space<vmem>>, vector<128x128xf32>,
    %c0_i32_11 = arith.constant 0 : i32
    %21 = arith.cmpi eq, %arg2, %c0_i32_11 : i32
    %22 = arith.extui %21 : i1 to i32
    %c0_i32_12 = arith.constant 0 : i32
    %23 = arith.cmpi ne, %22, %c0_i32_12 : i32
    scf.if %23 {
      %c0_15 = arith.constant 0 : index
      %c0_16 = arith.constant 0 : index
      %29 = vector.load %arg14[%c0_15, %c0_16] : memref<128x128xf32, #tpu.memory_space<vmem>>, vector<128x128xf32>
      %c0_17 = arith.constant 0 : index
      %c0_18 = arith.constant 0 : index
      %c0_19 = arith.constant 0 : index
      %30 = vector.load %arg6[%c0_17, %c0_18, %c0_19] : memref<1x128x1xf32, #tpu.memory_space<vmem>>, vector<1x128x1xf32>
      %31 = vector.shape_cast %30 : vector<1x128x1xf32> to vector<128x1xf32>
      %c0_20 = arith.constant 0 : index
      %c0_21 = arith.constant 0 : index
      %32 = vector.load %arg15[%c0_20, %c0_21] : memref<128x128xf32, #tpu.memory_space<vmem>>, vector<128x128xf32>
      %33 = vector.broadcast %31 : vector<128x1xf32> to vector<128x128xf32>
      %34 = arith.mulf %33, %32 : vector<128x128xf32>
      %35 = arith.addf %29, %34 : vector<128x128xf32>
      %c0_22 = arith.constant 0 : index
      %c0_23 = arith.constant 0 : index
      %36 = vector.load %arg14[%c0_22, %c0_23] : memref<128x128xf32, #tpu.memory_space<vmem>>, vector<128x128xf32>
      tpu.vector_store %arg14[%c0_22, %c0_23], %35 {strides = array<i32>} : memref<128x128xf32, #tpu.memory_space<vmem>>, vector<128x128xf32>,
    } else {
    }
    %c1_i32 = arith.constant 1 : i32
    %24 = arith.cmpi eq, %arg1, %c1_i32 : i32
    %c0_i32_13 = arith.constant 0 : i32
    %25 = arith.cmpi eq, %arg2, %c0_i32_13 : i32
    %26 = arith.andi %24, %25 : i1
    %27 = arith.extui %26 : i1 to i32
    %c0_i32_14 = arith.constant 0 : i32
    %28 = arith.cmpi ne, %27, %c0_i32_14 : i32
    scf.if %28 {
      %c0_15 = arith.constant 0 : index
      %c0_16 = arith.constant 0 : index
      %29 = vector.load %arg14[%c0_15, %c0_16] : memref<128x128xf32, #tpu.memory_space<vmem>>, vector<128x128xf32>
      %30 = arith.truncf %29 : vector<128x128xf32> to vector<128x128xbf16>
      %c0_17 = arith.constant 0 : index
      %c0_18 = arith.constant 0 : index
      %31 = vector.load %arg9[%c0_17, %c0_18] : memref<128x128xbf16, #tpu.memory_space<vmem>>, vector<128x128xbf16>
      %cst_19 = arith.constant dense<0.000000e+00> : vector<128x128xf32>
      %32 = tpu.matmul %30, %31, %cst_19 {dimension_numbers = #tpu.dot_dimension_numbers<[1], [0], [0], [1], [0, 0, 1, 1], [], []>} : vector<128x128xbf16>, vector<128x128xbf16>, vector<128x128xf32> -> vector<128x128xf32>
      %c0_20 = arith.constant 0 : index
      %c0_21 = arith.constant 0 : index
      %33 = vector.load %arg10[%c0_20, %c0_21] : memref<1x128xf32, #tpu.memory_space<vmem>>, vector<1x128xf32>
      %34 = vector.broadcast %33 : vector<1x128xf32> to vector<128x128xf32>
      %35 = arith.addf %32, %34 : vector<128x128xf32>
      %cst_22 = arith.constant 0.000000e+00 : f32
      %36 = vector.broadcast %cst_22 : f32 to vector<128x128xf32>
      %37 = arith.cmpf ogt, %35, %36 : vector<128x128xf32>
      %cst_23 = arith.constant 0.00999999977 : f32
      %38 = vector.broadcast %cst_23 : f32 to vector<128x128xf32>
      %39 = arith.mulf %38, %35 : vector<128x128xf32>
      %40 = arith.select %37, %35, %39 : vector<128x128xi1>, vector<128x128xf32>
      %41 = arith.truncf %40 : vector<128x128xf32> to vector<128x128xbf16>
      %c0_24 = arith.constant 0 : index
      %c0_25 = arith.constant 0 : index
      %42 = vector.load %arg11[%c0_24, %c0_25] : memref<128x128xbf16, #tpu.memory_space<vmem>>, vector<128x128xbf16>
      %cst_26 = arith.constant dense<0.000000e+00> : vector<128x128xf32>
      %43 = tpu.matmul %41, %42, %cst_26 {dimension_numbers = #tpu.dot_dimension_numbers<[1], [0], [0], [1], [0, 0, 1, 1], [], []>} : vector<128x128xbf16>, vector<128x128xbf16>, vector<128x128xf32> -> vector<128x128xf32>
      %c0_27 = arith.constant 0 : index
      %c0_28 = arith.constant 0 : index
      %44 = vector.load %arg12[%c0_27, %c0_28] : memref<1x128xf32, #tpu.memory_space<vmem>>, vector<1x128xf32>
      %45 = vector.broadcast %44 : vector<1x128xf32> to vector<128x128xf32>
      %46 = arith.addf %43, %45 : vector<128x128xf32>
      %c0_29 = arith.constant 0 : index
      %c0_30 = arith.constant 0 : index
      %47 = vector.load %arg13[%c0_29, %c0_30] : memref<128x128xf32, #tpu.memory_space<vmem>>, vector<128x128xf32>
      tpu.vector_store %arg13[%c0_29, %c0_30], %46 {strides = array<i32>} : memref<128x128xf32, #tpu.memory_space<vmem>>, vector<128x128xf32>,
    } else {
    }
    return
  }
  func.func @transform_0(%arg0: i32, %arg1: i32, %arg2: i32) -> (i32, i32) {
    %c0_i32 = arith.constant 0 : i32
    %c0_i32_0 = arith.constant 0 : i32
    return %arg0, %c0_i32 : i32, i32
  }
  func.func @transform_1(%arg0: i32, %arg1: i32, %arg2: i32) -> (i32, i32, i32) {
    %c0_i32 = arith.constant 0 : i32
    return %arg1, %arg0, %arg2 : i32, i32, i32
  }
  func.func @transform_2(%arg0: i32, %arg1: i32, %arg2: i32) -> (i32, i32, i32) {
    %c0_i32 = arith.constant 0 : i32
    %c0_i32_0 = arith.constant 0 : i32
    %c0_i32_1 = arith.constant 0 : i32
    %c0_i32_2 = arith.constant 0 : i32
    return %c0_i32, %c0_i32_0, %c0_i32_1 : i32, i32, i32
  }
  func.func @transform_3(%arg0: i32, %arg1: i32, %arg2: i32) -> (i32, i32, i32) {
    %c0_i32 = arith.constant 0 : i32
    %c0_i32_0 = arith.constant 0 : i32
    return %arg1, %arg0, %c0_i32 : i32, i32, i32
  }
  func.func @transform_4(%arg0: i32, %arg1: i32, %arg2: i32) -> (i32, i32) {
    %c0_i32 = arith.constant 0 : i32
    %c0_i32_0 = arith.constant 0 : i32
    %c0_i32_1 = arith.constant 0 : i32
    return %c0_i32, %c0_i32_0 : i32, i32
  }
  func.func @transform_5(%arg0: i32, %arg1: i32, %arg2: i32) -> (i32, i32) {
    %c0_i32 = arith.constant 0 : i32
    %c0_i32_0 = arith.constant 0 : i32
    %c0_i32_1 = arith.constant 0 : i32
    return %c0_i32, %c0_i32_0 : i32, i32
  }
  func.func @transform_6(%arg0: i32, %arg1: i32, %arg2: i32) -> (i32, i32) {
    %c0_i32 = arith.constant 0 : i32
    %c0_i32_0 = arith.constant 0 : i32
    %c0_i32_1 = arith.constant 0 : i32
    return %c0_i32, %c0_i32_0 : i32, i32
  }
  func.func @transform_7(%arg0: i32, %arg1: i32, %arg2: i32) -> (i32, i32) {
    %c0_i32 = arith.constant 0 : i32
    %c0_i32_0 = arith.constant 0 : i32
    %c0_i32_1 = arith.constant 0 : i32
    return %c0_i32, %c0_i32_0 : i32, i32
  }
  func.func @transform_8(%arg0: i32, %arg1: i32, %arg2: i32) -> (i32, i32) {
    %c0_i32 = arith.constant 0 : i32
    %c0_i32_0 = arith.constant 0 : i32
    %c0_i32_1 = arith.constant 0 : i32
    return %c0_i32, %c0_i32_0 : i32, i32
  }
  func.func @transform_9(%arg0: i32, %arg1: i32, %arg2: i32) -> (i32, i32) {
    %c0_i32 = arith.constant 0 : i32
    %c0_i32_0 = arith.constant 0 : i32
    %c0_i32_1 = arith.constant 0 : i32
    return %c0_i32, %c0_i32_0 : i32, i32
  }
  func.func @transform_10(%arg0: i32, %arg1: i32, %arg2: i32) -> (i32, i32) {
    %c0_i32 = arith.constant 0 : i32
    %c0_i32_0 = arith.constant 0 : i32
    return %arg0, %c0_i32 : i32, i32
  }
}

</mosaic_0001>

<bundles_post_ra>
// kernel: tweet_augmented_rgcn_forward.6
= control target key start
LH: loop header
LB: loop body
LE: loop exit
PB: predicated region body
PF: predicated region fallthrough
CT: control target
= control target key end

     0   :  { %vm90_vm0 = vcmask 1041408   ;;  %vm91_vm1 = vcmask 1042432   ;;  %v283_v1 = vmov 65535   ;;  %vm86_vm2 = vcmask 957440   ;;  %s374_s1 = inlined_call_operand.vmem [shape: bf16[117,128], index: 1, kind: input, shape index: {}]   ;;  %s375_s2 = inlined_call_operand.vmem [shape: f32[1,128], index: 2, kind: input, shape index: {}]   ;;  %s376_s3 = inlined_call_operand.vmem [shape: bf16[128,128], index: 3, kind: input, shape index: {}]   ;;  %s377_s0 = inlined_call_operand.vmem [shape: f32[8,117], index: 0, kind: input, shape index: {}]   ;;  %s378_s4 = inlined_call_operand.vmem [shape: f32[1,128], index: 4, kind: input, shape index: {}]   ;;  %s379_s5 = inlined_call_operand.vmem [shape: bf16[8,128], index: 5, kind: output, shape index: {}]  }
   0x1   :  { %v36_v0 = vld [vmem:[%s374_s1 + $0x38] sm:$0x7]  ;;  %v92_v2 = vsel %vm90_vm0, 4294967295, %v283_v1  ;;  %v271_v8 = vld [vmem:[%s374_s1 + $0x30] sm:$0xff]  ;;  %v270_v10 = vld [vmem:[%s374_s1 + $0x28] sm:$0xff] }
   0x2   :  { %v70_v3 = vunpack.c.l.b16 %v36_v0  ;;  %v93_v4 = vsel %vm91_vm1, %v92_v2, 0  ;;  %v279_v7 = vld [vmem:[%s376_s3 + $0x38] sm:$0xff]  ;;  %v278_v9 = vld [vmem:[%s376_s3 + $0x30] sm:$0xff]  ;;  %v277_v11 = vld [vmem:[%s376_s3 + $0x28] sm:$0xff] }
   0x3   :  { %182 = vmatpush.bf16.msra.mxu1 %v279_v7  ;;  %v269_v12 = vld [vmem:[%s374_s1 + $0x20] sm:$0xff]  ;;  %v268_v14 = vld [vmem:[%s374_s1 + $0x18] sm:$0xff]  ;;  %v267_v16 = vld [vmem:[%s374_s1 + $0x10] sm:$0xff] }
   0x4   :  { %v78_v5 = vpack.c.b16 %v70_v3, %v70_v3  ;;  %v276_v13 = vld [vmem:[%s376_s3 + $0x20] sm:$0xff]  ;;  %v275_v15 = vld [vmem:[%s376_s3 + $0x18] sm:$0xff]  ;;  %v274_v17 = vld [vmem:[%s376_s3 + $0x10] sm:$0xff] }
   0x5   :  { %v266_v18 = vld [vmem:[%s374_s1 + $0x8] sm:$0xff]  ;;  %v265_v19 = vld [vmem:[%s374_s1] sm:$0xff] }
   0x6   :  { %v95_v6 = vand.u32 %v93_v4, %v78_v5  ;;  %v20_v20 = vld [vmem:[%s377_s0] sm:$0xff]  ;;  %v273_v22 = vld [vmem:[%s376_s3 + $0x8] sm:$0xff] }
   0x7   :  { %183 = vmatpush.bf16.msra.mxu1 %v278_v9  ;;  %v21_v21 = vpack.c.bf16 %v20_v20, %v20_v20  ;;  %v272_v23 = vld [vmem:[%s376_s3] sm:$0xff] }
   0x8   :  { %97 = vmatpush.bf16.msra.mxu0 %v95_v6  ;;  %v281_v24 = vld [vmem:[%s375_s2] ss:$0 sm:$0xff] }
   0x9   :  { %v282_v31 = vld [vmem:[%s378_s4] ss:$0 sm:$0xff] }
   0xb   :  { %184 = vmatpush.bf16.msra.mxu1 %v277_v11 }
   0xc   :  { %98 = vmatpush.bf16.msra.mxu0 %v271_v8 }
   0xf   :  { %185 = vmatpush.bf16.msra.mxu1 %v276_v13 }
  0x10   :  { %99 = vmatpush.bf16.msra.mxu0 %v270_v10 }
  0x13   :  { %186 = vmatpush.bf16.msra.mxu1 %v275_v15 }
  0x14   :  { %100 = vmatpush.bf16.msra.mxu0 %v269_v12 }
  0x17   :  { %187 = vmatpush.bf16.msra.mxu1 %v274_v17 }
  0x18   :  { %101 = vmatpush.bf16.msra.mxu0 %v268_v14 }
  0x1b   :  { %188 = vmatpush.bf16.msra.mxu1 %v273_v22 }
  0x1c   :  { %102 = vmatpush.bf16.msra.mxu0 %v267_v16 }
  0x1f   :  { %189 = vmatpush.bf16.msra.mxu1 %v272_v23 }
  0x20   :  { %103 = vmatpush.bf16.msra.mxu0 %v266_v18 }
  0x24   :  { %104 = vmatpush.bf16.msra.mxu0 %v265_v19 }
  0x27   :  { %232 = vmatmul.msk.bf16.vlgmr.msra.gmra.mxu0 %vm86_vm2, %v21_v21 }
  0xa4   :  { %v106_v25 = vpop.f32.mrf.mxu0 }
  0xa5   :  { %v107_v26 = vadd.f32 %v281_v24, %v106_v25 }
  0xa7   :  { %v111_v27 = vmul.f32 0.01, %v107_v26  ;;  %vm110_vm3 = vcmp.gt.f32.partialorder %v107_v26, 0.0 }
  0xa9   :  { %v112_v28 = vsel %vm110_vm3, %v107_v26, %v111_v27 }
  0xaa   :  { %v113_v29 = vpack.c.bf16 %v112_v28, %v112_v28 }
  0xac   :  { %v108_v30 = vpop.f32.mrf.mxu0  ;;  %190 = vmatmul.bf16.vlgmr.msra.gmra.mxu1 %v113_v29 }
 0x129   :  { %v191_v32 = vpop.f32.mrf.mxu1 }
 0x12a   :  { %v192_v33 = vadd.f32 %v282_v31, %v191_v32 }
 0x12c   :  { %vm195_vm4 = vcmp.gt.f32.partialorder %v192_v33, 0.0  ;;  %v196_v34 = vmul.f32 0.01, %v192_v33 }
 0x12e   :  { %v197_v35 = vsel %vm195_vm4, %v192_v33, %v196_v34 }
 0x12f   :  { %v198_v36 = vpack.c.bf16 %v197_v35, %v197_v35 }
 0x131   :  { %199 = vst [vmem:[%s379_s5] sm:$0xf] %v198_v36  ;;  %v193_v37 = vpop.f32.mrf.mxu1 }

// kernel: tweet_augmented_rgcn_forward.7
= control target key start
LH: loop header
LB: loop body
LE: loop exit
PB: predicated region body
PF: predicated region fallthrough
CT: control target
= control target key end

     0   :  { %vm83_vm0 = vcmask 1041408   ;;  %vm79_vm1 = vcmask 818176   ;;  %s354_s1 = inlined_call_operand.vmem [shape: bf16[100,128], index: 1, kind: input, shape index: {}]   ;;  %s355_s3 = inlined_call_operand.vmem [shape: bf16[128,128], index: 3, kind: input, shape index: {}]   ;;  %s356_s2 = inlined_call_operand.vmem [shape: f32[1,128], index: 2, kind: input, shape index: {}]   ;;  %s357_s0 = inlined_call_operand.vmem [shape: f32[8,100], index: 0, kind: input, shape index: {}]   ;;  %s358_s4 = inlined_call_operand.vmem [shape: f32[1,128], index: 4, kind: input, shape index: {}]   ;;  %s359_s5 = inlined_call_operand.vmem [shape: bf16[8,128], index: 5, kind: output, shape index: {}]  }
   0x1   :  { %v35_v0 = vld [vmem:[%s354_s1 + $0x30] sm:$0x3]  ;;  %v264_v2 = vld [vmem:[%s355_s3 + $0x38] sm:$0xff]  ;;  %v256_v6 = vld [vmem:[%s354_s1 + $0x28] sm:$0xff] }
   0x2   :  { %v65_v1 = vunpack.c.l.b16 %v35_v0  ;;  %172 = vmatpush.bf16.msra.mxu1 %v264_v2  ;;  %v263_v4 = vld [vmem:[%s355_s3 + $0x30] sm:$0xff]  ;;  %v262_v7 = vld [vmem:[%s355_s3 + $0x28] sm:$0xff]  ;;  %v255_v8 = vld [vmem:[%s354_s1 + $0x20] sm:$0xff] }
   0x3   :  { %v261_v9 = vld [vmem:[%s355_s3 + $0x20] sm:$0xff]  ;;  %v254_v10 = vld [vmem:[%s354_s1 + $0x18] sm:$0xff]  ;;  %v253_v12 = vld [vmem:[%s354_s1 + $0x10] sm:$0xff] }
   0x4   :  { %v72_v3 = vpack.c.b16 %v65_v1, %v65_v1  ;;  %v260_v11 = vld [vmem:[%s355_s3 + $0x18] sm:$0xff]  ;;  %v259_v13 = vld [vmem:[%s355_s3 + $0x10] sm:$0xff]  ;;  %v252_v14 = vld [vmem:[%s354_s1 + $0x8] sm:$0xff] }
   0x5   :  { %v251_v15 = vld [vmem:[%s354_s1] sm:$0xff]  ;;  %v258_v18 = vld [vmem:[%s355_s3 + $0x8] sm:$0xff] }
   0x6   :  { %v85_v5 = vsel %vm83_vm0, %v72_v3, 0  ;;  %173 = vmatpush.bf16.msra.mxu1 %v263_v4  ;;  %v21_v16 = vld [vmem:[%s357_s0] sm:$0xff] }
   0x7   :  { %88 = vmatpush.bf16.msra.mxu0 %v85_v5  ;;  %v22_v17 = vpack.c.bf16 %v21_v16, %v21_v16  ;;  %v257_v19 = vld [vmem:[%s355_s3] sm:$0xff] }
   0x8   :  { %v265_v20 = vld [vmem:[%s356_s2] ss:$0 sm:$0xff] }
   0x9   :  { %v266_v27 = vld [vmem:[%s358_s4] ss:$0 sm:$0xff] }
   0xa   :  { %174 = vmatpush.bf16.msra.mxu1 %v262_v7 }
   0xb   :  { %89 = vmatpush.bf16.msra.mxu0 %v256_v6 }
   0xe   :  { %175 = vmatpush.bf16.msra.mxu1 %v261_v9 }
   0xf   :  { %90 = vmatpush.bf16.msra.mxu0 %v255_v8 }
  0x12   :  { %176 = vmatpush.bf16.msra.mxu1 %v260_v11 }
  0x13   :  { %91 = vmatpush.bf16.msra.mxu0 %v254_v10 }
  0x16   :  { %177 = vmatpush.bf16.msra.mxu1 %v259_v13 }
  0x17   :  { %92 = vmatpush.bf16.msra.mxu0 %v253_v12 }
  0x1a   :  { %178 = vmatpush.bf16.msra.mxu1 %v258_v18 }
  0x1b   :  { %93 = vmatpush.bf16.msra.mxu0 %v252_v14 }
  0x1e   :  { %179 = vmatpush.bf16.msra.mxu1 %v257_v19 }
  0x1f   :  { %94 = vmatpush.bf16.msra.mxu0 %v251_v15 }
  0x22   :  { %218 = vmatmul.msk.bf16.vlgmr.msra.gmra.mxu0 %vm79_vm1, %v22_v17 }
  0x9f   :  { %v96_v21 = vpop.f32.mrf.mxu0 }
  0xa0   :  { %v97_v22 = vadd.f32 %v265_v20, %v96_v21 }
  0xa2   :  { %v101_v23 = vmul.f32 0.01, %v97_v22  ;;  %vm100_vm2 = vcmp.gt.f32.partialorder %v97_v22, 0.0 }
  0xa4   :  { %v102_v24 = vsel %vm100_vm2, %v97_v22, %v101_v23 }
  0xa5   :  { %v103_v25 = vpack.c.bf16 %v102_v24, %v102_v24 }
  0xa7   :  { %v98_v26 = vpop.f32.mrf.mxu0  ;;  %180 = vmatmul.bf16.vlgmr.msra.gmra.mxu1 %v103_v25 }
 0x124   :  { %v181_v28 = vpop.f32.mrf.mxu1 }
 0x125   :  { %v182_v29 = vadd.f32 %v266_v27, %v181_v28 }
 0x127   :  { %vm185_vm3 = vcmp.gt.f32.partialorder %v182_v29, 0.0  ;;  %v186_v30 = vmul.f32 0.01, %v182_v29 }
 0x129   :  { %v187_v31 = vsel %vm185_vm3, %v182_v29, %v186_v30 }
 0x12a   :  { %v188_v32 = vpack.c.bf16 %v187_v31, %v187_v31 }
 0x12c   :  { %189 = vst [vmem:[%s359_s5] sm:$0xf] %v188_v32  ;;  %v183_v33 = vpop.f32.mrf.mxu1 }

// kernel: tweet_augmented_rgcn_forward.8
= control target key start
LH: loop header
LB: loop body
LE: loop exit
PB: predicated region body
PF: predicated region fallthrough
CT: control target
= control target key end

     0   :  { %s768_s1 = inlined_call_operand.vmem [shape: bf16[128,256], index: 1, kind: input, shape index: {}]   ;;  %s769_s0 = inlined_call_operand.vmem [shape: bf16[128,128], index: 0, kind: input, shape index: {}]   ;;  %s770_s2 = inlined_call_operand.vmem [shape: bf16[2,128,128], index: 2, kind: output, shape index: {}]  }
   0x1   :  { %v428_v0 = vld [vmem:[%s768_s1 + $0x70] sm:$0xf]  ;;  %v473_v1 = vld [vmem:[%s768_s1 + $0x74] sm:$0xf0]  ;;  %v472_v2 = vld [vmem:[%s768_s1 + $0x74] sm:$0xf] }
   0x2   :  { %v429_v3 = vor.u32 %v473_v1, %v428_v0  ;;  %v430_v4 = vld [vmem:[%s768_s1 + $0x78] sm:$0xf0]  ;;  %v420_v5 = vld [vmem:[%s768_s1 + $0x60] sm:$0xf]  ;;  %v471_v6 = vld [vmem:[%s768_s1 + $0x64] sm:$0xf0] }
   0x3   :  { %v433_v7 = vor.u32 %v472_v2, %v430_v4  ;;  %v470_v8 = vld [vmem:[%s768_s1 + $0x64] sm:$0xf]  ;;  %v422_v9 = vld [vmem:[%s768_s1 + $0x68] sm:$0xf0]  ;;  %v421_v10 = vor.u32 %v471_v6, %v420_v5  ;;  %v412_v12 = vld [vmem:[%s768_s1 + $0x50] sm:$0xf] }
   0x4   :  { %171 = vmatpush.bf16.msra.mxu0 %v429_v3  ;;  %569 = vmatpush.bf16.msra.mxu2 %v429_v3  ;;  %v425_v11 = vor.u32 %v470_v8, %v422_v9  ;;  %v469_v13 = vld [vmem:[%s768_s1 + $0x54] sm:$0xf0]  ;;  %v468_v14 = vld [vmem:[%s768_s1 + $0x54] sm:$0xf]  ;;  %v414_v15 = vld [vmem:[%s768_s1 + $0x58] sm:$0xf0] }
   0x5   :  { %220 = vmatpush.bf16.msra.mxu1 %v433_v7  ;;  %577 = vmatpush.bf16.msra.mxu3 %v433_v7  ;;  %v413_v16 = vor.u32 %v469_v13, %v412_v12  ;;  %v417_v17 = vor.u32 %v468_v14, %v414_v15  ;;  %v404_v18 = vld [vmem:[%s768_s1 + $0x40] sm:$0xf]  ;;  %v467_v19 = vld [vmem:[%s768_s1 + $0x44] sm:$0xf0]  ;;  %v466_v20 = vld [vmem:[%s768_s1 + $0x44] sm:$0xf] }
   0x6   :  { %v406_v21 = vld [vmem:[%s768_s1 + $0x48] sm:$0xf0]  ;;  %v405_v22 = vor.u32 %v467_v19, %v404_v18  ;;  %v396_v24 = vld [vmem:[%s768_s1 + $0x30] sm:$0xf]  ;;  %v465_v25 = vld [vmem:[%s768_s1 + $0x34] sm:$0xf0] }
   0x7   :  { %v409_v23 = vor.u32 %v466_v20, %v406_v21  ;;  %v464_v26 = vld [vmem:[%s768_s1 + $0x34] sm:$0xf]  ;;  %v398_v27 = vld [vmem:[%s768_s1 + $0x38] sm:$0xf0]  ;;  %v397_v28 = vor.u32 %v465_v25, %v396_v24  ;;  %v388_v30 = vld [vmem:[%s768_s1 + $0x20] sm:$0xf] }
   0x8   :  { %172 = vmatpush.bf16.msra.mxu0 %v421_v10  ;;  %570 = vmatpush.bf16.msra.mxu2 %v421_v10  ;;  %v401_v29 = vor.u32 %v464_v26, %v398_v27  ;;  %v463_v31 = vld [vmem:[%s768_s1 + $0x24] sm:$0xf0]  ;;  %v462_v32 = vld [vmem:[%s768_s1 + $0x24] sm:$0xf]  ;;  %v390_v33 = vld [vmem:[%s768_s1 + $0x28] sm:$0xf0] }
   0x9   :  { %221 = vmatpush.bf16.msra.mxu1 %v425_v11  ;;  %578 = vmatpush.bf16.msra.mxu3 %v425_v11  ;;  %v389_v34 = vor.u32 %v463_v31, %v388_v30  ;;  %v393_v35 = vor.u32 %v462_v32, %v390_v33  ;;  %v380_v36 = vld [vmem:[%s768_s1 + $0x10] sm:$0xf]  ;;  %v461_v37 = vld [vmem:[%s768_s1 + $0x14] sm:$0xf0]  ;;  %v460_v38 = vld [vmem:[%s768_s1 + $0x14] sm:$0xf] }
   0xa   :  { %v382_v39 = vld [vmem:[%s768_s1 + $0x18] sm:$0xf0]  ;;  %v381_v40 = vor.u32 %v461_v37, %v380_v36  ;;  %v372_v42 = vld [vmem:[%s768_s1] sm:$0xf]  ;;  %v459_v43 = vld [vmem:[%s768_s1 + $0x4] sm:$0xf0] }
   0xb   :  { %v385_v41 = vor.u32 %v460_v38, %v382_v39  ;;  %v458_v44 = vld [vmem:[%s768_s1 + $0x4] sm:$0xf]  ;;  %v374_v45 = vld [vmem:[%s768_s1 + $0x8] sm:$0xf0]  ;;  %v373_v46 = vor.u32 %v459_v43, %v372_v42  ;;  %v452_v52 = vld [vmem:[%s769_s0 + $0x10] sm:$0xff] }
   0xc   :  { %173 = vmatpush.bf16.msra.mxu0 %v413_v16  ;;  %571 = vmatpush.bf16.msra.mxu2 %v413_v16  ;;  %v377_v47 = vor.u32 %v458_v44, %v374_v45  ;;  %v450_v48 = vld [vmem:[%s769_s0] sm:$0xff]  ;;  %v451_v50 = vld [vmem:[%s769_s0 + $0x8] sm:$0xff]  ;;  %v456_v53 = vld [vmem:[%s769_s0 + $0x30] sm:$0xff] }
   0xd   :  { %222 = vmatpush.bf16.msra.mxu1 %v417_v17  ;;  %579 = vmatpush.bf16.msra.mxu3 %v417_v17  ;;  %v454_v49 = vld [vmem:[%s769_s0 + $0x20] sm:$0xff]  ;;  %v455_v51 = vld [vmem:[%s769_s0 + $0x28] sm:$0xff]  ;;  %v453_v54 = vld [vmem:[%s769_s0 + $0x18] sm:$0xff] }
   0xe   :  { %v457_v55 = vld [vmem:[%s769_s0 + $0x38] sm:$0xff] }
  0x10   :  { %174 = vmatpush.bf16.msra.mxu0 %v405_v22  ;;  %572 = vmatpush.bf16.msra.mxu2 %v405_v22 }
  0x11   :  { %223 = vmatpush.bf16.msra.mxu1 %v409_v23  ;;  %580 = vmatpush.bf16.msra.mxu3 %v409_v23 }
  0x14   :  { %175 = vmatpush.bf16.msra.mxu0 %v397_v28  ;;  %573 = vmatpush.bf16.msra.mxu2 %v397_v28 }
  0x15   :  { %224 = vmatpush.bf16.msra.mxu1 %v401_v29  ;;  %581 = vmatpush.bf16.msra.mxu3 %v401_v29 }
  0x18   :  { %176 = vmatpush.bf16.msra.mxu0 %v389_v34  ;;  %574 = vmatpush.bf16.msra.mxu2 %v389_v34 }
  0x19   :  { %225 = vmatpush.bf16.msra.mxu1 %v393_v35  ;;  %582 = vmatpush.bf16.msra.mxu3 %v393_v35 }
  0x1c   :  { %177 = vmatpush.bf16.msra.mxu0 %v381_v40  ;;  %575 = vmatpush.bf16.msra.mxu2 %v381_v40 }
  0x1d   :  { %226 = vmatpush.bf16.msra.mxu1 %v385_v41  ;;  %583 = vmatpush.bf16.msra.mxu3 %v385_v41 }
  0x20   :  { %178 = vmatpush.bf16.msra.mxu0 %v373_v46  ;;  %576 = vmatpush.bf16.msra.mxu2 %v373_v46 }
  0x21   :  { %227 = vmatpush.bf16.msra.mxu1 %v377_v47  ;;  %584 = vmatpush.bf16.msra.mxu3 %v377_v47 }
  0x23   :  { %179 = vmatmul.bf16.vlgmr.msra.gmra.mxu0 %v450_v48  ;;  %199 = vmatmul.bf16.vlgmr.msra.gmra.mxu2 %v454_v49 }
  0x24   :  { %228 = vmatmul.bf16.vlgmr.msra.gmra.mxu1 %v450_v48  ;;  %248 = vmatmul.bf16.vlgmr.msra.gmra.mxu3 %v454_v49 }
  0x33   :  { %184 = vmatmul.bf16.gmra.mxu0 %v451_v50  ;;  %204 = vmatmul.bf16.gmra.mxu2 %v455_v51 }
  0x34   :  { %233 = vmatmul.bf16.gmra.mxu1 %v451_v50  ;;  %253 = vmatmul.bf16.gmra.mxu3 %v455_v51 }
  0x43   :  { %189 = vmatmul.bf16.gmra.mxu0 %v452_v52  ;;  %209 = vmatmul.bf16.gmra.mxu2 %v456_v53 }
  0x44   :  { %238 = vmatmul.bf16.gmra.mxu1 %v452_v52  ;;  %258 = vmatmul.bf16.gmra.mxu3 %v456_v53 }
  0x53   :  { %194 = vmatmul.bf16.gmra.mxu0 %v453_v54  ;;  %214 = vmatmul.bf16.gmra.mxu2 %v457_v55 }
  0x54   :  { %243 = vmatmul.bf16.gmra.mxu1 %v453_v54  ;;  %263 = vmatmul.bf16.gmra.mxu3 %v457_v55 }
  0xa0   :  { %v180_v56 = vpop.f32.mrf.mxu0 }
  0xa1   :  { %v229_v57 = vpop.f32.mrf.mxu1 }
  0xa6   :  { %v200_v58 = vpop.f32.mrf.mxu2 }
  0xa7   :  { %v249_v59 = vpop.f32.mrf.mxu3 }
  0xa8   :  { %v182_v60 = vpop.f32.mrf.mxu0 }
  0xa9   :  { %v477_v61 = vpack.c.bf16 %v182_v60, %v180_v56  ;;  %v231_v62 = vpop.f32.mrf.mxu1 }
  0xaa   :  { %v517_v63 = vpack.c.bf16 %v231_v62, %v229_v57 }
  0xab   :  { %478 = vst [vmem:[%s770_s2] sm:$0xff] %v477_v61  }
  0xac   :  { %561 = vst [vmem:[%s770_s2 + $0x40] sm:$0xff] %v517_v63  }
  0xae   :  { %v202_v0 = vpop.f32.mrf.mxu2 }
  0xaf   :  { %v497_v1 = vpack.c.bf16 %v202_v0, %v200_v58  ;;  %v251_v2 = vpop.f32.mrf.mxu3 }
  0xb0   :  { %v537_v3 = vpack.c.bf16 %v251_v2, %v249_v59  ;;  %v185_v4 = vpop.f32.mrf.mxu0 }
  0xb1   :  { %557 = vst [vmem:[%s770_s2 + $0x20] sm:$0xff] %v497_v1   ;;  %v234_v5 = vpop.f32.mrf.mxu1 }
  0xb2   :  { %565 = vst [vmem:[%s770_s2 + $0x60] sm:$0xff] %v537_v3  }
  0xb6   :  { %v205_v6 = vpop.f32.mrf.mxu2 }
  0xb7   :  { %v254_v7 = vpop.f32.mrf.mxu3 }
  0xb8   :  { %v187_v8 = vpop.f32.mrf.mxu0 }
  0xb9   :  { %v482_v9 = vpack.c.bf16 %v187_v8, %v185_v4  ;;  %v236_v10 = vpop.f32.mrf.mxu1 }
  0xba   :  { %v522_v11 = vpack.c.bf16 %v236_v10, %v234_v5 }
  0xbb   :  { %554 = vst [vmem:[%s770_s2 + $0x8] sm:$0xff] %v482_v9  }
  0xbc   :  { %562 = vst [vmem:[%s770_s2 + $0x48] sm:$0xff] %v522_v11  }
  0xbe   :  { %v207_v12 = vpop.f32.mrf.mxu2 }
  0xbf   :  { %v502_v13 = vpack.c.bf16 %v207_v12, %v205_v6  ;;  %v256_v14 = vpop.f32.mrf.mxu3 }
  0xc0   :  { %v542_v15 = vpack.c.bf16 %v256_v14, %v254_v7  ;;  %v190_v16 = vpop.f32.mrf.mxu0 }
  0xc1   :  { %558 = vst [vmem:[%s770_s2 + $0x28] sm:$0xff] %v502_v13   ;;  %v239_v17 = vpop.f32.mrf.mxu1 }
  0xc2   :  { %566 = vst [vmem:[%s770_s2 + $0x68] sm:$0xff] %v542_v15  }
  0xc6   :  { %v210_v18 = vpop.f32.mrf.mxu2 }
  0xc7   :  { %v259_v19 = vpop.f32.mrf.mxu3 }
  0xc8   :  { %v192_v20 = vpop.f32.mrf.mxu0 }
  0xc9   :  { %v487_v21 = vpack.c.bf16 %v192_v20, %v190_v16  ;;  %v241_v22 = vpop.f32.mrf.mxu1 }
  0xca   :  { %v527_v23 = vpack.c.bf16 %v241_v22, %v239_v17 }
  0xcb   :  { %555 = vst [vmem:[%s770_s2 + $0x10] sm:$0xff] %v487_v21  }
  0xcc   :  { %563 = vst [vmem:[%s770_s2 + $0x50] sm:$0xff] %v527_v23  }
  0xce   :  { %v212_v24 = vpop.f32.mrf.mxu2 }
  0xcf   :  { %v507_v25 = vpack.c.bf16 %v212_v24, %v210_v18  ;;  %v261_v26 = vpop.f32.mrf.mxu3 }
  0xd0   :  { %v547_v27 = vpack.c.bf16 %v261_v26, %v259_v19  ;;  %v195_v28 = vpop.f32.mrf.mxu0 }
  0xd1   :  { %559 = vst [vmem:[%s770_s2 + $0x30] sm:$0xff] %v507_v25   ;;  %v244_v29 = vpop.f32.mrf.mxu1 }
  0xd2   :  { %567 = vst [vmem:[%s770_s2 + $0x70] sm:$0xff] %v547_v27  }
  0xd6   :  { %v215_v30 = vpop.f32.mrf.mxu2 }
  0xd7   :  { %v264_v31 = vpop.f32.mrf.mxu3 }
  0xd8   :  { %v197_v32 = vpop.f32.mrf.mxu0 }
  0xd9   :  { %v492_v33 = vpack.c.bf16 %v197_v32, %v195_v28  ;;  %v246_v34 = vpop.f32.mrf.mxu1 }
  0xda   :  { %v532_v35 = vpack.c.bf16 %v246_v34, %v244_v29 }
  0xdb   :  { %556 = vst [vmem:[%s770_s2 + $0x18] sm:$0xff] %v492_v33  }
  0xdc   :  { %564 = vst [vmem:[%s770_s2 + $0x58] sm:$0xff] %v532_v35  }
  0xde   :  { %v217_v36 = vpop.f32.mrf.mxu2 }
  0xdf   :  { %v512_v37 = vpack.c.bf16 %v217_v36, %v215_v30  ;;  %v266_v38 = vpop.f32.mrf.mxu3 }
  0xe0   :  { %v552_v39 = vpack.c.bf16 %v266_v38, %v264_v31 }
  0xe1   :  { %560 = vst [vmem:[%s770_s2 + $0x38] sm:$0xff] %v512_v37  }
  0xe2   :  { %568 = vst [vmem:[%s770_s2 + $0x78] sm:$0xff] %v552_v39  }

// kernel: tweet_augmented_rgcn_forward.9
= control target key start
LH: loop header
LB: loop body
LE: loop exit
PB: predicated region body
PF: predicated region fallthrough
CT: control target
= control target key end

     0   :  { %s1511_s21 = smov 0   ;;  %s1513_s22 = smov 0   ;;  %s1695_s0 = inlined_call_operand.vmem [shape: bf16[128,128], index: 0, kind: input, shape index: {}]   ;;  %s1696_s1 = inlined_call_operand.vmem [shape: s8[2,128,128], index: 1, kind: input, shape index: {}]   ;;  %s1697_s2 = inlined_call_operand.vmem [shape: bf16[2,128,128], index: 2, kind: input, shape index: {}]   ;;  %s1698_s3 = inlined_call_operand.vmem [shape: f32[2,128,1], index: 3, kind: input, shape index: {}]   ;;  %s1699_s4 = inlined_call_operand.vmem [shape: bf16[128,128], index: 4, kind: input, shape index: {}]   ;;  %s1700_s5 = inlined_call_operand.vmem [shape: f32[1,128], index: 5, kind: input, shape index: {}]   ;;  %s1701_s6 = inlined_call_operand.vmem [shape: bf16[128,128], index: 6, kind: output, shape index: {}]  }
   0x1   :  { %s1515_s23 = smov 0  }
   0x2 LB: > { %s31_s24 = sadd.s32 1, %s1469_s22  ;;  %p1150_p0 = scmp.ge.s32.totalorder %s1473_s23, 1  ;;  %s1473_s23 = sphi %s1515_s23, %s16_s23   ;;  %s1469_s22 = sphi %s1513_s22, %s1703_s22   ;;  %s1465_s21 = sphi %s1511_s21, %s1702_s21  }
   0x3   : > { %p33_p1 = scmp.ge.s32.totalorder %s31_s24, 2  ;;  %p271_p2 = scmp.lt.s32.totalorder %s1473_s23, 3 }
   0x5   : > { %s1705_s24 = smov (%p33_p1, %s31_s24), 0  ;;  %p272_p3 = pnand %p1150_p0, %p271_p2 }
   0x6   : > { %p329_p4 = scmp.lt.s32.totalorder (!%p272_p3), %s1465_s21, 1  ;;  %p357_p5 = scmp.eq.s32.totalorder (!%p272_p3), %s1465_s21, 0 }
   0x7   : > { %275 = sbr.rel (%p272_p3) target bundleno = 413 (0x19d), region = 44 }
   0xc   : > { %s330_s25 = scalar_select %p329_p4, %s1465_s21, 1  ;;  %v1277_v0 = vld [vmem:[%s1699_s4 + $0x38] sm:$0xff] (%p357_p5)  ;;  %v1276_v1 = vld [vmem:[%s1699_s4 + $0x30] sm:$0xff] (%p357_p5)  ;;  %v1275_v2 = vld [vmem:[%s1699_s4 + $0x28] sm:$0xff] (%p357_p5) }
   0xd   : > { %362 = sbr.rel (!%p357_p5) target bundleno = 205 (0xcd), region = 48  ;;  %495 = vmatpush.bf16.msra.mxu0 (%p357_p5), %v1277_v0  ;;  %1367 = vmatpush.bf16.msra.mxu1 (%p357_p5), %v1277_v0  ;;  %v1274_v3 = vld [vmem:[%s1699_s4 + $0x20] sm:$0xff] (%p357_p5)  ;;  %v1273_v4 = vld [vmem:[%s1699_s4 + $0x18] sm:$0xff] (%p357_p5)  ;;  %v1272_v5 = vld [vmem:[%s1699_s4 + $0x10] sm:$0xff] (%p357_p5) }
   0xe   : > { %s1259_s26 = sshll.u32 %s330_s25, 5  ;;  %s1260_s27 = sshll.u32 %s330_s25, 7  ;;  %1368 = vmatpush.bf16.msra.mxu2 (%p357_p5), %v1277_v0  ;;  %1369 = vmatpush.bf16.msra.mxu3 (%p357_p5), %v1277_v0  ;;  %v1271_v6 = vld [vmem:[%s1699_s4 + $0x8] sm:$0xff] (%p357_p5)  ;;  %v1270_v7 = vld [vmem:[%s1699_s4] sm:$0xff] (%p357_p5)  ;;  %v1264_v9 = vld [vmem:[%s1695_s0 + $0x10] sm:$0xff] (%p357_p5) }
   0xf   : > { %s1537_s30 = scalar_lea.vmem %s1696_s1, %s1259_s26  ;;  %s1542_s9 = scalar_lea.vmem %s1698_s3, %s1260_s27  ;;  %v1262_v8 = vld [vmem:[%s1695_s0] sm:$0xff] (%p357_p5)  ;;  %v1268_v11 = vld [vmem:[%s1695_s0 + $0x30] sm:$0xff] (%p357_p5)  ;;  %v1263_v12 = vld [vmem:[%s1695_s0 + $0x8] sm:$0xff] (%p357_p5) }
  0x10   : > { %v1266_v10 = vld [vmem:[%s1695_s0 + $0x20] sm:$0xff] (%p357_p5)  ;;  %v1265_v13 = vld [vmem:[%s1695_s0 + $0x18] sm:$0xff] (%p357_p5)  ;;  %v1267_v14 = vld [vmem:[%s1695_s0 + $0x28] sm:$0xff] (%p357_p5) }
  0x11   : > { %496 = vmatpush.bf16.msra.mxu0 (%p357_p5), %v1276_v1  ;;  %1370 = vmatpush.bf16.msra.mxu1 (%p357_p5), %v1276_v1  ;;  %v1269_v15 = vld [vmem:[%s1695_s0 + $0x38] sm:$0xff] (%p357_p5)  ;;  %v1447_v16 = vld [vmem:[%s1700_s5] ss:$0 sm:$0xff] (%p357_p5) }
  0x12   : > { %1371 = vmatpush.bf16.msra.mxu2 %v1276_v1  ;;  %1372 = vmatpush.bf16.msra.mxu3 %v1276_v1 }
  0x15   : > { %497 = vmatpush.bf16.msra.mxu0 %v1275_v2  ;;  %1373 = vmatpush.bf16.msra.mxu1 %v1275_v2 }
  0x16   : > { %1374 = vmatpush.bf16.msra.mxu2 %v1275_v2  ;;  %1375 = vmatpush.bf16.msra.mxu3 %v1275_v2 }
  0x19   : > { %498 = vmatpush.bf16.msra.mxu0 %v1274_v3  ;;  %1376 = vmatpush.bf16.msra.mxu1 %v1274_v3 }
  0x1a   : > { %1377 = vmatpush.bf16.msra.mxu2 %v1274_v3  ;;  %1378 = vmatpush.bf16.msra.mxu3 %v1274_v3 }
  0x1d   : > { %499 = vmatpush.bf16.msra.mxu0 %v1273_v4  ;;  %1379 = vmatpush.bf16.msra.mxu1 %v1273_v4 }
  0x1e   : > { %1380 = vmatpush.bf16.msra.mxu2 %v1273_v4  ;;  %1381 = vmatpush.bf16.msra.mxu3 %v1273_v4 }
  0x21   : > { %500 = vmatpush.bf16.msra.mxu0 %v1272_v5  ;;  %1382 = vmatpush.bf16.msra.mxu1 %v1272_v5 }
  0x22   : > { %1383 = vmatpush.bf16.msra.mxu2 %v1272_v5  ;;  %1384 = vmatpush.bf16.msra.mxu3 %v1272_v5 }
  0x25   : > { %501 = vmatpush.bf16.msra.mxu0 %v1271_v6  ;;  %1385 = vmatpush.bf16.msra.mxu1 %v1271_v6 }
  0x26   : > { %1386 = vmatpush.bf16.msra.mxu2 %v1271_v6  ;;  %1387 = vmatpush.bf16.msra.mxu3 %v1271_v6 }
  0x29   : > { %502 = vmatpush.bf16.msra.mxu0 %v1270_v7  ;;  %1388 = vmatpush.bf16.msra.mxu1 %v1270_v7 }
  0x2a   : > { %1389 = vmatpush.bf16.msra.mxu2 %v1270_v7  ;;  %1390 = vmatpush.bf16.msra.mxu3 %v1270_v7 }
  0x2c   : > { %503 = vmatmul.bf16.vlgmr.msra.gmra.mxu0 %v1262_v8  ;;  %513 = vmatmul.bf16.vlgmr.msra.gmra.mxu1 %v1264_v9 }
  0x2d   : > { %523 = vmatmul.bf16.vlgmr.msra.gmra.mxu2 %v1266_v10  ;;  %533 = vmatmul.bf16.vlgmr.msra.gmra.mxu3 %v1268_v11 }
  0x3c   : > { %508 = vmatmul.bf16.gmra.mxu0 %v1263_v12  ;;  %518 = vmatmul.bf16.gmra.mxu1 %v1265_v13 }
  0x3d   : > { %528 = vmatmul.bf16.gmra.mxu2 %v1267_v14  ;;  %538 = vmatmul.bf16.gmra.mxu3 %v1269_v15 }
  0xa9   : > { %v504_v17 = vpop.f32.mrf.mxu0  ;;  %v514_v18 = vpop.f32.mrf.mxu1 }
  0xaa   : > { %v505_v19 = vadd.f32 %v1447_v16, %v504_v17  ;;  %v515_v20 = vadd.f32 %v1447_v16, %v514_v18 }
  0xac   : > { %544 = vst [vmem:[#allocation2 + $0x30] sm:$0xff] %v505_v19 }
  0xad   : > { %548 = vst [vmem:[#allocation2 + $0x50] sm:$0xff] %v515_v20 }
  0xb0   : > { %v524_v21 = vpop.f32.mrf.mxu2  ;;  %v534_v22 = vpop.f32.mrf.mxu3 }
  0xb1   : > { %v525_v23 = vadd.f32 %v1447_v16, %v524_v21  ;;  %v535_v24 = vadd.f32 %v1447_v16, %v534_v22  ;;  %v506_v25 = vpop.f32.mrf.mxu0  ;;  %v516_v26 = vpop.f32.mrf.mxu1 }
  0xb2   : > { %v507_v27 = vadd.f32 %v1447_v16, %v506_v25  ;;  %v517_v28 = vadd.f32 %v1447_v16, %v516_v26 }
  0xb3   : > { %552 = vst [vmem:[#allocation2 + $0x40] sm:$0xff] %v525_v23 }
  0xb4   : > { %556 = vst [vmem:[#allocation2 + $0x60] sm:$0xff] %v535_v24 }
  0xb5   : > { %545 = vst [vmem:[#allocation2] sm:$0xff] %v507_v27 }
  0xb6   : > { %549 = vst [vmem:[#allocation2 + $0x68] sm:$0xff] %v517_v28 }
  0xb8   : > { %v526_v29 = vpop.f32.mrf.mxu2  ;;  %v536_v30 = vpop.f32.mrf.mxu3 }
  0xb9   : > { %v527_v31 = vadd.f32 %v1447_v16, %v526_v29  ;;  %v537_v32 = vadd.f32 %v1447_v16, %v536_v30  ;;  %v509_v33 = vpop.f32.mrf.mxu0  ;;  %v519_v34 = vpop.f32.mrf.mxu1 }
  0xba   : > { %v510_v35 = vadd.f32 %v1447_v16, %v509_v33  ;;  %v520_v36 = vadd.f32 %v1447_v16, %v519_v34 }
  0xbb   : > { %553 = vst [vmem:[#allocation2 + $0x20] sm:$0xff] %v527_v31 }
  0xbc   : > { %557 = vst [vmem:[#allocation2 + $0x70] sm:$0xff] %v537_v32 }
  0xbd   : > { %546 = vst [vmem:[#allocation2 + $0x58] sm:$0xff] %v510_v35 }
  0xbe   : > { %550 = vst [vmem:[#allocation2 + $0x8] sm:$0xff] %v520_v36 }
  0xc0   : > { %v529_v37 = vpop.f32.mrf.mxu2  ;;  %v539_v38 = vpop.f32.mrf.mxu3 }
  0xc1   : > { %v530_v39 = vadd.f32 %v1447_v16, %v529_v37  ;;  %v540_v40 = vadd.f32 %v1447_v16, %v539_v38  ;;  %v511_v41 = vpop.f32.mrf.mxu0  ;;  %v521_v42 = vpop.f32.mrf.mxu1 }
  0xc2   : > { %v512_v43 = vadd.f32 %v1447_v16, %v511_v41  ;;  %v522_v44 = vadd.f32 %v1447_v16, %v521_v42 }
  0xc3   : > { %554 = vst [vmem:[#allocation2 + $0x10] sm:$0xff] %v530_v39 }
  0xc4   : > { %558 = vst [vmem:[#allocation2 + $0x78] sm:$0xff] %v540_v40 }
  0xc5   : > { %547 = vst [vmem:[#allocation2 + $0x18] sm:$0xff] %v512_v43 }
  0xc6   : > { %551 = vst [vmem:[#allocation2 + $0x48] sm:$0xff] %v522_v44 }
  0xc8   : > { %v531_v45 = vpop.f32.mrf.mxu2  ;;  %v541_v46 = vpop.f32.mrf.mxu3 }
  0xc9   : > { %v532_v47 = vadd.f32 %v1447_v16, %v531_v45  ;;  %v542_v48 = vadd.f32 %v1447_v16, %v541_v46 }
  0xcb   : > { %555 = vst [vmem:[#allocation2 + $0x38] sm:$0xff] %v532_v47 }
  0xcc   : > { %559 = vst [vmem:[#allocation2 + $0x28] sm:$0xff] %v542_v48 }
  0xcd PF: > { %v822_v49 = vld [vmem:[%s1542_s9] sm:$0xff]  ;;  %s1278_s7 = sshll.u32 %s1465_s21, 6  ;;  %v824_v50 = vld [vmem:[%s1542_s9 + $0x10] sm:$0xff]  ;;  %v1475_v51 = vmov 0   ;;  %v823_v55 = vld [vmem:[%s1542_s9 + $0x8] sm:$0xff]  ;;  %p982_p6 = scmp.eq.s32.totalorder %s1465_s21, 1 }
  0xce   : > { %1448 = vset.pattern.permute.xlu0 %v1475_v51  ;;  %s1601_s11 = scalar_lea.vmem %s1697_s2, %s1278_s7  ;;  %1449 = vset.pattern.permute.xlu1 %v1475_v51  ;;  %v826_v54 = vld [vmem:[%s1542_s9 + $0x20] sm:$0xff]  ;;  %v825_v56 = vld [vmem:[%s1542_s9 + $0x18] sm:$0xff]  ;;  %v827_v59 = vld [vmem:[%s1542_s9 + $0x28] sm:$0xff] }
  0xcf   : > { %856 = vperm.xlu0 %1448, %v822_v49   ;;  %v1286_v52 = vld [vmem:[%s1601_s11 + $0x38] sm:$0xff]  ;;  %866 = vperm.xlu1 %1449, %v824_v50   ;;  %v1285_v53 = vld [vmem:[%s1601_s11 + $0x30] sm:$0xff]  ;;  %v1284_v57 = vld [vmem:[%s1601_s11 + $0x28] sm:$0xff] }
  0xd0   : > { %1450 = vset.pattern.permute.xlu2 %v1475_v51  ;;  %722 = vmatpush.bf16.msra.mxu0 %v1286_v52  ;;  %v1283_v58 = vld [vmem:[%s1601_s11 + $0x20] sm:$0xff]  ;;  %v828_v60 = vld [vmem:[%s1542_s9 + $0x30] sm:$0xff]  ;;  %v829_v61 = vld [vmem:[%s1542_s9 + $0x38] sm:$0xff] }
  0xd1   : > { %1391 = vmatpush.bf16.msra.mxu1 %v1286_v52  ;;  %1392 = vmatpush.bf16.msra.mxu2 %v1286_v52  ;;  %v1282_v62 = vld [vmem:[%s1601_s11 + $0x18] sm:$0xff]  ;;  %v1281_v63 = vld [vmem:[%s1601_s11 + $0x10] sm:$0xff]  ;;  %v1616_v0 = vld [vmem:[%s1537_s30] sm:$0xff]  }
  0xd2   : > { %1393 = vmatpush.bf16.msra.mxu3 %v1286_v52  ;;  %876 = vperm.xlu2 %1450, %v826_v54   ;;  %v1619_v1 = vld [vmem:[%s1537_s30 + $0x8] sm:$0xff]   ;;  %v830_v2 = vld [vmem:[%s1542_s9 + $0x40] sm:$0xff]  ;;  %v1623_v3 = vld [vmem:[%s1537_s30 + $0x10] sm:$0xff]   ;;  %v1337_v6 = vunpack.c.0.s8 %v1616_v0  ;;  %v1338_v7 = vunpack.c.1.s8 %v1616_v0  ;;  %v1341_v34 = vunpack.c.2.s8 %v1616_v0  ;;  %v1342_v35 = vunpack.c.3.s8 %v1616_v0 }
  0xd3   : > { %v1626_v4 = vld [vmem:[%s1537_s30 + $0x18] sm:$0xff]   ;;  %v831_v5 = vld [vmem:[%s1542_s9 + $0x48] sm:$0xff]  ;;  %v1345_v8 = vunpack.c.0.s8 %v1619_v1  ;;  %v1346_v9 = vunpack.c.1.s8 %v1619_v1  ;;  %v832_v10 = vld [vmem:[%s1542_s9 + $0x50] sm:$0xff]  ;;  %v1353_v12 = vunpack.c.0.s8 %v1623_v3  ;;  %v1354_v13 = vunpack.c.1.s8 %v1623_v3 }
  0xd4   : > { %723 = vmatpush.bf16.msra.mxu0 %v1285_v53  ;;  %v1280_v11 = vld [vmem:[%s1601_s11 + $0x8] sm:$0xff]  ;;  %v1361_v14 = vunpack.c.0.s8 %v1626_v4  ;;  %v1362_v15 = vunpack.c.1.s8 %v1626_v4  ;;  %v650_v16 = vcvt.s32.f32 %v1337_v6  ;;  %v651_v17 = vcvt.s32.f32 %v1338_v7  ;;  %v1279_v20 = vld [vmem:[%s1601_s11] sm:$0xff]  ;;  %v833_v25 = vld [vmem:[%s1542_s9 + $0x58] sm:$0xff] }
  0xd5   : > { %1394 = vmatpush.bf16.msra.mxu1 %v1285_v53  ;;  %1395 = vmatpush.bf16.msra.mxu2 %v1285_v53  ;;  %v654_v18 = vcvt.s32.f32 %v1345_v8  ;;  %v655_v19 = vcvt.s32.f32 %v1346_v9  ;;  %v658_v21 = vcvt.s32.f32 %v1353_v12  ;;  %v659_v22 = vcvt.s32.f32 %v1354_v13  ;;  %v834_v26 = vld [vmem:[%s1542_s9 + $0x60] sm:$0xff]  ;;  %v835_v29 = vld [vmem:[%s1542_s9 + $0x68] sm:$0xff]  ;;  %v836_v32 = vld [vmem:[%s1542_s9 + $0x70] sm:$0xff] }
  0xd6   : > { %1396 = vmatpush.bf16.msra.mxu3 %v1285_v53  ;;  %v662_v23 = vcvt.s32.f32 %v1361_v14  ;;  %v663_v24 = vcvt.s32.f32 %v1362_v15  ;;  %v666_v27 = vpack.c.bf16 %v651_v17, %v650_v16  ;;  %v837_v33 = vld [vmem:[%s1542_s9 + $0x78] sm:$0xff]  ;;  %v1349_v36 = vunpack.c.2.s8 %v1619_v1  ;;  %v806_v0 = vld [vmem:[#allocation2 + $0x30] sm:$0xff]  ;;  %v818_v13 = vld [vmem:[#allocation2 + $0x60] sm:$0xff] }
  0xd7   : > { %861 = vperm.xlu0 %1448, %v823_v55   ;;  %871 = vperm.xlu1 %1449, %v825_v56   ;;  %v668_v28 = vpack.c.bf16 %v655_v19, %v654_v18  ;;  %v670_v30 = vpack.c.bf16 %v659_v22, %v658_v21  ;;  %v1350_v37 = vunpack.c.3.s8 %v1619_v1  ;;  %v1357_v38 = vunpack.c.2.s8 %v1623_v3  ;;  %v807_v17 = vld [vmem:[#allocation2] sm:$0xff]  ;;  %v811_v19 = vld [vmem:[#allocation2 + $0x68] sm:$0xff] }
  0xd8   : > { %724 = vmatpush.bf16.msra.mxu0 %v1284_v57  ;;  %v672_v31 = vpack.c.bf16 %v663_v24, %v662_v23  ;;  %v1358_v39 = vunpack.c.3.s8 %v1623_v3  ;;  %v1365_v40 = vunpack.c.2.s8 %v1626_v4  ;;  %v1366_v41 = vunpack.c.3.s8 %v1626_v4 }
  0xd9   : > { %1397 = vmatpush.bf16.msra.mxu1 %v1284_v57  ;;  %1398 = vmatpush.bf16.msra.mxu2 %v1284_v57  ;;  %v652_v42 = vcvt.s32.f32 %v1341_v34  ;;  %v653_v43 = vcvt.s32.f32 %v1342_v35  ;;  %v656_v44 = vcvt.s32.f32 %v1349_v36  ;;  %v657_v45 = vcvt.s32.f32 %v1350_v37  ;;  %v808_v35 = vld [vmem:[#allocation2 + $0x58] sm:$0xff]  ;;  %v812_v37 = vld [vmem:[#allocation2 + $0x8] sm:$0xff] }
  0xda   : > { %1399 = vmatpush.bf16.msra.mxu3 %v1284_v57  ;;  %881 = vperm.xlu2 %1450, %v827_v59   ;;  %v660_v46 = vcvt.s32.f32 %v1357_v38  ;;  %v661_v47 = vcvt.s32.f32 %v1358_v39  ;;  %v664_v48 = vcvt.s32.f32 %v1365_v40  ;;  %v665_v49 = vcvt.s32.f32 %v1366_v41 }
  0xdb   : > { %v667_v50 = vpack.c.bf16 %v653_v43, %v652_v42  ;;  %v669_v51 = vpack.c.bf16 %v657_v45, %v656_v44 }
  0xdc   : > { %725 = vmatpush.bf16.msra.mxu0 %v1283_v58  ;;  %v671_v52 = vpack.c.bf16 %v661_v47, %v660_v46  ;;  %v673_v53 = vpack.c.bf16 %v665_v49, %v664_v48  ;;  %v816_v46 = vld [vmem:[#allocation2 + $0x10] sm:$0xff]  ;;  %v820_v48 = vld [vmem:[#allocation2 + $0x78] sm:$0xff] }
  0xdd   : > { %1400 = vmatpush.bf16.msra.mxu1 %v1283_v58  ;;  %1401 = vmatpush.bf16.msra.mxu2 %v1283_v58 }
  0xde   : > { %1402 = vmatpush.bf16.msra.mxu3 %v1283_v58 }
  0xdf   : > { %886 = vperm.xlu0 %1448, %v828_v60   ;;  %891 = vperm.xlu1 %1449, %v829_v61  }
  0xe0   : > { %726 = vmatpush.bf16.msra.mxu0 %v1282_v62 }
  0xe1   : > { %1403 = vmatpush.bf16.msra.mxu1 %v1282_v62  ;;  %1404 = vmatpush.bf16.msra.mxu2 %v1282_v62 }
  0xe2   : > { %1405 = vmatpush.bf16.msra.mxu3 %v1282_v62  ;;  %896 = vperm.xlu2 %1450, %v830_v2   ;;  %v810_v2 = vld [vmem:[#allocation2 + $0x50] sm:$0xff] }
  0xe4   : > { %727 = vmatpush.bf16.msra.mxu0 %v1281_v63 }
  0xe5   : > { %1406 = vmatpush.bf16.msra.mxu1 %v1281_v63  ;;  %1407 = vmatpush.bf16.msra.mxu2 %v1281_v63 }
  0xe6   : > { %1408 = vmatpush.bf16.msra.mxu3 %v1281_v63 }
  0xe7   : > { %901 = vperm.xlu0 %1448, %v831_v5   ;;  %906 = vperm.xlu1 %1449, %v832_v10  }
  0xe8   : > { %728 = vmatpush.bf16.msra.mxu0 %v1280_v11 }
  0xe9   : > { %1409 = vmatpush.bf16.msra.mxu1 %v1280_v11  ;;  %1410 = vmatpush.bf16.msra.mxu2 %v1280_v11 }
  0xea   : > { %1411 = vmatpush.bf16.msra.mxu3 %v1280_v11  ;;  %911 = vperm.xlu2 %1450, %v833_v25   ;;  %v814_v11 = vld [vmem:[#allocation2 + $0x40] sm:$0xff] }
  0xec   : > { %729 = vmatpush.bf16.msra.mxu0 %v1279_v20 }
  0xed   : > { %1412 = vmatpush.bf16.msra.mxu1 %v1279_v20  ;;  %1413 = vmatpush.bf16.msra.mxu2 %v1279_v20 }
  0xee   : > { %1414 = vmatpush.bf16.msra.mxu3 %v1279_v20 }
  0xef   : > { %916 = vperm.xlu0 %1448, %v834_v26   ;;  %921 = vperm.xlu1 %1449, %v835_v29   ;;  %v815_v29 = vld [vmem:[#allocation2 + $0x20] sm:$0xff] }
  0xf0   : > { %730 = vmatmul.bf16.vlgmr.msra.gmra.mxu0 %v666_v27  ;;  %740 = vmatmul.bf16.vlgmr.msra.gmra.mxu1 %v668_v28 }
  0xf1   : > { %750 = vmatmul.bf16.vlgmr.msra.gmra.mxu2 %v670_v30  ;;  %760 = vmatmul.bf16.vlgmr.msra.gmra.mxu3 %v672_v31  ;;  %v819_v31 = vld [vmem:[#allocation2 + $0x70] sm:$0xff] }
  0xf2   : > { %926 = vperm.xlu2 %1450, %v836_v32  }
  0xf7   : > { %931 = vperm.xlu0 %1448, %v837_v33  }
 0x100   : > { %735 = vmatmul.bf16.gmra.mxu0 %v667_v50  ;;  %745 = vmatmul.bf16.gmra.mxu1 %v669_v51 }
 0x101   : > { %755 = vmatmul.bf16.gmra.mxu2 %v671_v52  ;;  %765 = vmatmul.bf16.gmra.mxu3 %v673_v53  ;;  %v809_v52 = vld [vmem:[#allocation2 + $0x18] sm:$0xff] }
 0x12c   : > { %v877_v57 = vpop.permute.xlu2 %876 }
 0x134   : > { %v882_v60 = vpop.permute.xlu2 %881 }
 0x13c   : > { %v897_v5 = vpop.permute.xlu2 %896 }
 0x141   : > { %v857_v54 = vpop.permute.xlu0 %856  ;;  %v867_v55 = vpop.permute.xlu1 %866 }
 0x144   : > { %v912_v26 = vpop.permute.xlu2 %911 }
 0x149   : > { %v862_v56 = vpop.permute.xlu0 %861  ;;  %v1654_v58 = vpop.permute.xlu1 %871 }
 0x14c   : > { %v927_v44 = vpop.permute.xlu2 %926 }
 0x151   : > { %v887_v59 = vpop.permute.xlu0 %886  ;;  %v1656_v61 = vpop.permute.xlu1 %891 }
 0x159   : > { %v902_v62 = vpop.permute.xlu0 %901  ;;  %v907_v8 = vpop.permute.xlu1 %906 }
 0x161   : > { %v917_v9 = vpop.permute.xlu0 %916  ;;  %v922_v27 = vpop.permute.xlu1 %921 }
 0x16d   : > { %v731_v63 = vpop.f32.mrf.mxu0  ;;  %v741_v1 = vpop.f32.mrf.mxu1 }
 0x16e   : > { %v934_v3 = vmul.f32 %v857_v54, %v731_v63  ;;  %v938_v4 = vmul.f32 %v877_v57, %v741_v1  ;;  %v813_v54 = vld [vmem:[#allocation2 + $0x48] sm:$0xff]  ;;  %v932_v63 = vpop.permute.xlu0 %931  ;;  %v817_v1 = vld [vmem:[#allocation2 + $0x38] sm:$0xff] }
 0x170   : > { %v950_v6 = vadd.f32 %v934_v3, %v806_v0  ;;  %v954_v7 = vadd.f32 %v938_v4, %v810_v2  ;;  %v821_v3 = vld [vmem:[#allocation2 + $0x28] sm:$0xff] }
 0x172   : > { %966 = vst [vmem:[#allocation2 + $0x30] sm:$0xff] %v950_v6 }
 0x173   : > { %970 = vst [vmem:[#allocation2 + $0x50] sm:$0xff] %v954_v7 }
 0x174   : > { %v751_v10 = vpop.f32.mrf.mxu2  ;;  %v761_v12 = vpop.f32.mrf.mxu3 }
 0x175   : > { %v942_v14 = vmul.f32 %v897_v5, %v751_v10  ;;  %v946_v15 = vmul.f32 %v917_v9, %v761_v12  ;;  %v733_v16 = vpop.f32.mrf.mxu0  ;;  %v743_v18 = vpop.f32.mrf.mxu1 }
 0x176   : > { %v935_v20 = vmul.f32 %v862_v56, %v733_v16  ;;  %v939_v21 = vmul.f32 %v882_v60, %v743_v18 }
 0x177   : > { %v958_v22 = vadd.f32 %v942_v14, %v814_v11  ;;  %v962_v23 = vadd.f32 %v946_v15, %v818_v13 }
 0x178   : > { %v951_v24 = vadd.f32 %v935_v20, %v807_v17  ;;  %v955_v25 = vadd.f32 %v939_v21, %v811_v19 }
 0x179   : > { %974 = vst [vmem:[#allocation2 + $0x40] sm:$0xff] %v958_v22 }
 0x17a   : > { %978 = vst [vmem:[#allocation2 + $0x60] sm:$0xff] %v962_v23  ;;  %v991_v11 = vld [vmem:[#allocation2 + $0x50] sm:$0xff] (%p982_p6) }
 0x17b   : > { %967 = vst [vmem:[#allocation2] sm:$0xff] %v951_v24 }
 0x17c   : > { %971 = vst [vmem:[#allocation2 + $0x68] sm:$0xff] %v955_v25  ;;  %v753_v28 = vpop.f32.mrf.mxu2  ;;  %v763_v30 = vpop.f32.mrf.mxu3 }
 0x17d   : > { %v943_v32 = vmul.f32 %v902_v62, %v753_v28  ;;  %v947_v33 = vmul.f32 %v922_v27, %v763_v30  ;;  %v736_v34 = vpop.f32.mrf.mxu0  ;;  %v746_v36 = vpop.f32.mrf.mxu1 }
 0x17e   : > { %v936_v38 = vmul.f32 %v867_v55, %v736_v34  ;;  %v940_v39 = vmul.f32 %v887_v59, %v746_v36 }
 0x17f   : > { %v959_v40 = vadd.f32 %v943_v32, %v815_v29  ;;  %v963_v41 = vadd.f32 %v947_v33, %v819_v31 }
 0x180   : > { %v952_v42 = vadd.f32 %v936_v38, %v808_v35  ;;  %v956_v43 = vadd.f32 %v940_v39, %v812_v37  ;;  %v995_v17 = vld [vmem:[#allocation2 + $0x40] sm:$0xff] (%p982_p6) }
 0x181   : > { %975 = vst [vmem:[#allocation2 + $0x20] sm:$0xff] %v959_v40  ;;  %v999_v24 = vld [vmem:[#allocation2 + $0x60] sm:$0xff] (%p982_p6) }
 0x182   : > { %979 = vst [vmem:[#allocation2 + $0x70] sm:$0xff] %v963_v41 }
 0x183   : > { %968 = vst [vmem:[#allocation2 + $0x58] sm:$0xff] %v952_v42  ;;  %v992_v12 = vld [vmem:[#allocation2 + $0x68] sm:$0xff] (%p982_p6) }
 0x184   : > { %972 = vst [vmem:[#allocation2 + $0x8] sm:$0xff] %v956_v43  ;;  %v756_v45 = vpop.f32.mrf.mxu2  ;;  %v766_v47 = vpop.f32.mrf.mxu3  ;;  %v1301_v14 = vpack.c.bf16 (%p982_p6), %v992_v12, %v991_v11 }
 0x185   : > { %v944_v49 = vmul.f32 %v907_v8, %v756_v45  ;;  %v948_v50 = vmul.f32 %v927_v44, %v766_v47  ;;  %v738_v51 = vpop.f32.mrf.mxu0  ;;  %v748_v53 = vpop.f32.mrf.mxu1 }
 0x186   : > { %v937_v55 = vmul.f32 %v1654_v58, %v738_v51  ;;  %v941_v56 = vmul.f32 %v1656_v61, %v748_v53  ;;  %v987_v58 = vld [vmem:[#allocation2 + $0x30] sm:$0xff] (%p982_p6)  ;;  %v988_v61 = vld [vmem:[#allocation2] sm:$0xff] (%p982_p6)  ;;  %1329 = vst [vmem:[%s1701_s6 + $0x10] sm:$0xff] (%p982_p6), %v1301_v14  }
 0x187   : > { %v960_v57 = vadd.f32 %v944_v49, %v816_v46  ;;  %v964_v59 = vadd.f32 %v948_v50, %v820_v48  ;;  %v1291_v9 = vpack.c.bf16 (%p982_p6), %v988_v61, %v987_v58 }
 0x188   : > { %v953_v60 = vadd.f32 %v937_v55, %v809_v52  ;;  %v957_v62 = vadd.f32 %v941_v56, %v813_v54  ;;  %v996_v19 = vld [vmem:[#allocation2 + $0x20] sm:$0xff] (%p982_p6) }
 0x189   : > { %976 = vst [vmem:[#allocation2 + $0x10] sm:$0xff] %v960_v57  ;;  %v1311_v22 = vpack.c.bf16 (%p982_p6), %v996_v19, %v995_v17  ;;  %v1000_v25 = vld [vmem:[#allocation2 + $0x70] sm:$0xff] (%p982_p6) }
 0x18a   : > { %980 = vst [vmem:[#allocation2 + $0x78] sm:$0xff] %v964_v59  ;;  %v989_v8 = vld [vmem:[#allocation2 + $0x58] sm:$0xff] (%p982_p6)  ;;  %v1321_v27 = vpack.c.bf16 (%p982_p6), %v1000_v25, %v999_v24 }
 0x18b   : > { %969 = vst [vmem:[#allocation2 + $0x18] sm:$0xff] %v953_v60  ;;  %v993_v15 = vld [vmem:[#allocation2 + $0x8] sm:$0xff] (%p982_p6) }
 0x18c   : > { %973 = vst [vmem:[#allocation2 + $0x48] sm:$0xff] %v957_v62  ;;  %v758_v0 = vpop.f32.mrf.mxu2  ;;  %v768_v2 = vpop.f32.mrf.mxu3 }
 0x18d   : > { %v945_v4 = vmul.f32 %v912_v26, %v758_v0  ;;  %v949_v5 = vmul.f32 %v932_v63, %v768_v2  ;;  %1292 = vst [vmem:[%s1701_s6] sm:$0xff] (%p982_p6), %v1291_v9  }
 0x18e   : > { %986 = sbr.rel (!%p982_p6) target bundleno = 413 (0x19d), region = 60  ;;  %1331 = vst [vmem:[%s1701_s6 + $0x20] sm:$0xff] (%p982_p6), %v1311_v22  }
 0x18f   : > { %v961_v6 = vadd.f32 %v945_v4, %v817_v1  ;;  %v965_v7 = vadd.f32 %v949_v5, %v821_v3  ;;  %1333 = vst [vmem:[%s1701_s6 + $0x30] sm:$0xff] (%p982_p6), %v1321_v27  }
 0x190   : > { %v997_v20 = vld [vmem:[#allocation2 + $0x10] sm:$0xff] (%p982_p6) }
 0x191   : > { %977 = vst [vmem:[#allocation2 + $0x38] sm:$0xff] %v961_v6  ;;  %v1001_v26 = vld [vmem:[#allocation2 + $0x78] sm:$0xff] (%p982_p6) }
 0x192   : > { %981 = vst [vmem:[#allocation2 + $0x28] sm:$0xff] %v965_v7  ;;  %v990_v10 = vld [vmem:[#allocation2 + $0x18] sm:$0xff] (%p982_p6) }
 0x193   : > { %v1296_v13 = vpack.c.bf16 %v990_v10, %v989_v8  ;;  %v994_v16 = vld [vmem:[#allocation2 + $0x48] sm:$0xff] }
 0x194   : > { %v1306_v18 = vpack.c.bf16 %v994_v16, %v993_v15 }
 0x195   : > { %1328 = vst [vmem:[%s1701_s6 + $0x8] sm:$0xff] %v1296_v13  }
 0x196   : > { %1330 = vst [vmem:[%s1701_s6 + $0x18] sm:$0xff] %v1306_v18  }
 0x198   : > { %v998_v21 = vld [vmem:[#allocation2 + $0x38] sm:$0xff] }
 0x199   : > { %v1316_v23 = vpack.c.bf16 %v998_v21, %v997_v20  ;;  %v1002_v28 = vld [vmem:[#allocation2 + $0x28] sm:$0xff] }
 0x19a   : > { %v1326_v29 = vpack.c.bf16 %v1002_v28, %v1001_v26 }
 0x19b   : > { %1332 = vst [vmem:[%s1701_s6 + $0x28] sm:$0xff] %v1316_v23  }
 0x19c   : > { %1334 = vst [vmem:[%s1701_s6 + $0x38] sm:$0xff] %v1326_v29  }
 0x19d PF: > { %s16_s23 = sadd.s32 1, %s1473_s23   ;;  %s1702_s21 = smov %s1469_s22 }
 0x19e   : > { %p13_p7 = scmp.ge.s32.totalorder %s16_s23, 4   ;;  %s1703_s22 = smov %s1705_s24 }
 0x1a0   :  { %15 = sbr.rel (!%p13_p7) target bundleno = 2 (0x2), region = 97 }

// kernel: tweet_augmented_rgcn_forward.11
= control target key start
LH: loop header
LB: loop body
LE: loop exit
PB: predicated region body
PF: predicated region fallthrough
CT: control target
= control target key end

     0   :  { %s1972_s13 = smov 0   ;;  %s1974_s14 = smov 0   ;;  %s2252_s0 = inlined_call_operand.vmem [shape: bf16[128,128], index: 0, kind: input, shape index: {}]   ;;  %s2253_s1 = inlined_call_operand.vmem [shape: s8[2,128,128], index: 1, kind: input, shape index: {}]   ;;  %s2254_s2 = inlined_call_operand.vmem [shape: bf16[2,128,128], index: 2, kind: input, shape index: {}]   ;;  %s2255_s3 = inlined_call_operand.vmem [shape: f32[2,128,1], index: 3, kind: input, shape index: {}]   ;;  %s2256_s4 = inlined_call_operand.vmem [shape: bf16[128,128], index: 4, kind: input, shape index: {}]   ;;  %s2257_s5 = inlined_call_operand.vmem [shape: f32[1,128], index: 5, kind: input, shape index: {}]   ;;  %s2258_s6 = inlined_call_operand.vmem [shape: bf16[128,128], index: 6, kind: input, shape index: {}]   ;;  %s2259_s7 = inlined_call_operand.vmem [shape: f32[1,128], index: 7, kind: input, shape index: {}]   ;;  %s2260_s8 = inlined_call_operand.vmem [shape: bf16[128,128], index: 8, kind: input, shape index: {}]   ;;  %s2261_s9 = inlined_call_operand.vmem [shape: f32[1,128], index: 9, kind: input, shape index: {}]   ;;  %s2262_s10 = inlined_call_operand.vmem [shape: f32[128,128], index: 10, kind: output, shape index: {}]  }
   0x1   :  { %s1976_s15 = smov 0  }
   0x2 LB: > { %s35_s16 = sadd.s32 1, %s1910_s14  ;;  %p1540_p0 = scmp.ge.s32.totalorder %s1914_s15, 1  ;;  %s1914_s15 = sphi %s1976_s15, %s20_s15   ;;  %s1910_s14 = sphi %s1974_s14, %s2264_s14   ;;  %s1906_s13 = sphi %s1972_s13, %s2263_s13  }
   0x3   : > { %p37_p1 = scmp.ge.s32.totalorder %s35_s16, 2  ;;  %p371_p2 = scmp.lt.s32.totalorder %s1914_s15, 3 }
   0x5   : > { %s2266_s16 = smov (%p37_p1, %s35_s16), 0  ;;  %p372_p3 = pnand %p1540_p0, %p371_p2 }
   0x6   : > { %p437_p4 = scmp.lt.s32.totalorder (!%p372_p3), %s1906_s13, 1  ;;  %p465_p5 = scmp.eq.s32.totalorder (!%p372_p3), %s1906_s13, 0 }
   0x7   : > { %375 = sbr.rel (%p372_p3) target bundleno = 760 (0x2f8), region = 60 }
   0xc   : > { %s438_s17 = scalar_select %p437_p4, %s1906_s13, 1  ;;  %v1731_v0 = vld [vmem:[%s2256_s4 + $0x38] sm:$0xff] (%p465_p5)  ;;  %v1730_v1 = vld [vmem:[%s2256_s4 + $0x30] sm:$0xff] (%p465_p5)  ;;  %v1729_v2 = vld [vmem:[%s2256_s4 + $0x28] sm:$0xff] (%p465_p5) }
   0xd   : > { %470 = sbr.rel (!%p465_p5) target bundleno = 205 (0xcd), region = 64  ;;  %603 = vmatpush.bf16.msra.mxu0 (%p465_p5), %v1731_v0  ;;  %1790 = vmatpush.bf16.msra.mxu1 (%p465_p5), %v1731_v0  ;;  %v1728_v3 = vld [vmem:[%s2256_s4 + $0x20] sm:$0xff] (%p465_p5)  ;;  %v1727_v4 = vld [vmem:[%s2256_s4 + $0x18] sm:$0xff] (%p465_p5)  ;;  %v1726_v5 = vld [vmem:[%s2256_s4 + $0x10] sm:$0xff] (%p465_p5) }
   0xe   : > { %s1713_s18 = sshll.u32 %s438_s17, 5  ;;  %s1714_s19 = sshll.u32 %s438_s17, 7  ;;  %1791 = vmatpush.bf16.msra.mxu2 (%p465_p5), %v1731_v0  ;;  %1792 = vmatpush.bf16.msra.mxu3 (%p465_p5), %v1731_v0  ;;  %v1725_v6 = vld [vmem:[%s2256_s4 + $0x8] sm:$0xff] (%p465_p5)  ;;  %v1724_v7 = vld [vmem:[%s2256_s4] sm:$0xff] (%p465_p5)  ;;  %v1718_v9 = vld [vmem:[%s2252_s0 + $0x10] sm:$0xff] (%p465_p5) }
   0xf   : > { %s1998_s22 = scalar_lea.vmem %s2253_s1, %s1713_s18  ;;  %s2003_s25 = scalar_lea.vmem %s2255_s3, %s1714_s19  ;;  %v1716_v8 = vld [vmem:[%s2252_s0] sm:$0xff] (%p465_p5)  ;;  %v1722_v11 = vld [vmem:[%s2252_s0 + $0x30] sm:$0xff] (%p465_p5)  ;;  %v1717_v12 = vld [vmem:[%s2252_s0 + $0x8] sm:$0xff] (%p465_p5) }
  0x10   : > { %v1720_v10 = vld [vmem:[%s2252_s0 + $0x20] sm:$0xff] (%p465_p5)  ;;  %v1719_v13 = vld [vmem:[%s2252_s0 + $0x18] sm:$0xff] (%p465_p5)  ;;  %v1721_v14 = vld [vmem:[%s2252_s0 + $0x28] sm:$0xff] (%p465_p5) }
  0x11   : > { %604 = vmatpush.bf16.msra.mxu0 (%p465_p5), %v1730_v1  ;;  %1793 = vmatpush.bf16.msra.mxu1 (%p465_p5), %v1730_v1  ;;  %v1723_v15 = vld [vmem:[%s2252_s0 + $0x38] sm:$0xff] (%p465_p5)  ;;  %v1886_v16 = vld [vmem:[%s2257_s5] ss:$0 sm:$0xff] (%p465_p5) }
  0x12   : > { %1794 = vmatpush.bf16.msra.mxu2 %v1730_v1  ;;  %1795 = vmatpush.bf16.msra.mxu3 %v1730_v1 }
  0x15   : > { %605 = vmatpush.bf16.msra.mxu0 %v1729_v2  ;;  %1796 = vmatpush.bf16.msra.mxu1 %v1729_v2 }
  0x16   : > { %1797 = vmatpush.bf16.msra.mxu2 %v1729_v2  ;;  %1798 = vmatpush.bf16.msra.mxu3 %v1729_v2 }
  0x19   : > { %606 = vmatpush.bf16.msra.mxu0 %v1728_v3  ;;  %1799 = vmatpush.bf16.msra.mxu1 %v1728_v3 }
  0x1a   : > { %1800 = vmatpush.bf16.msra.mxu2 %v1728_v3  ;;  %1801 = vmatpush.bf16.msra.mxu3 %v1728_v3 }
  0x1d   : > { %607 = vmatpush.bf16.msra.mxu0 %v1727_v4  ;;  %1802 = vmatpush.bf16.msra.mxu1 %v1727_v4 }
  0x1e   : > { %1803 = vmatpush.bf16.msra.mxu2 %v1727_v4  ;;  %1804 = vmatpush.bf16.msra.mxu3 %v1727_v4 }
  0x21   : > { %608 = vmatpush.bf16.msra.mxu0 %v1726_v5  ;;  %1805 = vmatpush.bf16.msra.mxu1 %v1726_v5 }
  0x22   : > { %1806 = vmatpush.bf16.msra.mxu2 %v1726_v5  ;;  %1807 = vmatpush.bf16.msra.mxu3 %v1726_v5 }
  0x25   : > { %609 = vmatpush.bf16.msra.mxu0 %v1725_v6  ;;  %1808 = vmatpush.bf16.msra.mxu1 %v1725_v6 }
  0x26   : > { %1809 = vmatpush.bf16.msra.mxu2 %v1725_v6  ;;  %1810 = vmatpush.bf16.msra.mxu3 %v1725_v6 }
  0x29   : > { %610 = vmatpush.bf16.msra.mxu0 %v1724_v7  ;;  %1811 = vmatpush.bf16.msra.mxu1 %v1724_v7 }
  0x2a   : > { %1812 = vmatpush.bf16.msra.mxu2 %v1724_v7  ;;  %1813 = vmatpush.bf16.msra.mxu3 %v1724_v7 }
  0x2c   : > { %611 = vmatmul.bf16.vlgmr.msra.gmra.mxu0 %v1716_v8  ;;  %621 = vmatmul.bf16.vlgmr.msra.gmra.mxu1 %v1718_v9 }
  0x2d   : > { %631 = vmatmul.bf16.vlgmr.msra.gmra.mxu2 %v1720_v10  ;;  %641 = vmatmul.bf16.vlgmr.msra.gmra.mxu3 %v1722_v11 }
  0x3c   : > { %616 = vmatmul.bf16.gmra.mxu0 %v1717_v12  ;;  %626 = vmatmul.bf16.gmra.mxu1 %v1719_v13 }
  0x3d   : > { %636 = vmatmul.bf16.gmra.mxu2 %v1721_v14  ;;  %646 = vmatmul.bf16.gmra.mxu3 %v1723_v15 }
  0xa9   : > { %v612_v17 = vpop.f32.mrf.mxu0  ;;  %v622_v18 = vpop.f32.mrf.mxu1 }
  0xaa   : > { %v613_v19 = vadd.f32 %v1886_v16, %v612_v17  ;;  %v623_v20 = vadd.f32 %v1886_v16, %v622_v18 }
  0xac   : > { %652 = vst [vmem:[#allocation2 + $0x30] sm:$0xff] %v613_v19 }
  0xad   : > { %656 = vst [vmem:[#allocation2 + $0x50] sm:$0xff] %v623_v20 }
  0xb0   : > { %v632_v21 = vpop.f32.mrf.mxu2  ;;  %v642_v22 = vpop.f32.mrf.mxu3 }
  0xb1   : > { %v633_v23 = vadd.f32 %v1886_v16, %v632_v21  ;;  %v643_v24 = vadd.f32 %v1886_v16, %v642_v22  ;;  %v614_v25 = vpop.f32.mrf.mxu0  ;;  %v624_v26 = vpop.f32.mrf.mxu1 }
  0xb2   : > { %v615_v27 = vadd.f32 %v1886_v16, %v614_v25  ;;  %v625_v28 = vadd.f32 %v1886_v16, %v624_v26 }
  0xb3   : > { %660 = vst [vmem:[#allocation2 + $0x40] sm:$0xff] %v633_v23 }
  0xb4   : > { %664 = vst [vmem:[#allocation2 + $0x60] sm:$0xff] %v643_v24 }
  0xb5   : > { %653 = vst [vmem:[#allocation2] sm:$0xff] %v615_v27 }
  0xb6   : > { %657 = vst [vmem:[#allocation2 + $0x68] sm:$0xff] %v625_v28 }
  0xb8   : > { %v634_v29 = vpop.f32.mrf.mxu2  ;;  %v644_v30 = vpop.f32.mrf.mxu3 }
  0xb9   : > { %v635_v31 = vadd.f32 %v1886_v16, %v634_v29  ;;  %v645_v32 = vadd.f32 %v1886_v16, %v644_v30  ;;  %v617_v33 = vpop.f32.mrf.mxu0  ;;  %v627_v34 = vpop.f32.mrf.mxu1 }
  0xba   : > { %v618_v35 = vadd.f32 %v1886_v16, %v617_v33  ;;  %v628_v36 = vadd.f32 %v1886_v16, %v627_v34 }
  0xbb   : > { %661 = vst [vmem:[#allocation2 + $0x20] sm:$0xff] %v635_v31 }
  0xbc   : > { %665 = vst [vmem:[#allocation2 + $0x70] sm:$0xff] %v645_v32 }
  0xbd   : > { %654 = vst [vmem:[#allocation2 + $0x58] sm:$0xff] %v618_v35 }
  0xbe   : > { %658 = vst [vmem:[#allocation2 + $0x8] sm:$0xff] %v628_v36 }
  0xc0   : > { %v637_v37 = vpop.f32.mrf.mxu2  ;;  %v647_v38 = vpop.f32.mrf.mxu3 }
  0xc1   : > { %v638_v39 = vadd.f32 %v1886_v16, %v637_v37  ;;  %v648_v40 = vadd.f32 %v1886_v16, %v647_v38  ;;  %v619_v41 = vpop.f32.mrf.mxu0  ;;  %v629_v42 = vpop.f32.mrf.mxu1 }
  0xc2   : > { %v620_v43 = vadd.f32 %v1886_v16, %v619_v41  ;;  %v630_v44 = vadd.f32 %v1886_v16, %v629_v42 }
  0xc3   : > { %662 = vst [vmem:[#allocation2 + $0x10] sm:$0xff] %v638_v39 }
  0xc4   : > { %666 = vst [vmem:[#allocation2 + $0x78] sm:$0xff] %v648_v40 }
  0xc5   : > { %655 = vst [vmem:[#allocation2 + $0x18] sm:$0xff] %v620_v43 }
  0xc6   : > { %659 = vst [vmem:[#allocation2 + $0x48] sm:$0xff] %v630_v44 }
  0xc8   : > { %v639_v45 = vpop.f32.mrf.mxu2  ;;  %v649_v46 = vpop.f32.mrf.mxu3 }
  0xc9   : > { %v640_v47 = vadd.f32 %v1886_v16, %v639_v45  ;;  %v650_v48 = vadd.f32 %v1886_v16, %v649_v46 }
  0xcb   : > { %663 = vst [vmem:[#allocation2 + $0x38] sm:$0xff] %v640_v47 }
  0xcc   : > { %667 = vst [vmem:[#allocation2 + $0x28] sm:$0xff] %v650_v48 }
  0xcd PF: > { %v930_v49 = vld [vmem:[%s2003_s25] sm:$0xff]  ;;  %s1732_s12 = sshll.u32 %s1906_s13, 6  ;;  %v932_v50 = vld [vmem:[%s2003_s25 + $0x10] sm:$0xff]  ;;  %v1916_v51 = vmov 0   ;;  %v931_v55 = vld [vmem:[%s2003_s25 + $0x8] sm:$0xff]  ;;  %p1090_p6 = scmp.eq.s32.totalorder %s1906_s13, 1 }
  0xce   : > { %1887 = vset.pattern.permute.xlu0 %v1916_v51  ;;  %s2062_s19 = scalar_lea.vmem %s2254_s2, %s1732_s12  ;;  %1888 = vset.pattern.permute.xlu1 %v1916_v51  ;;  %v934_v54 = vld [vmem:[%s2003_s25 + $0x20] sm:$0xff]  ;;  %v933_v56 = vld [vmem:[%s2003_s25 + $0x18] sm:$0xff]  ;;  %v935_v59 = vld [vmem:[%s2003_s25 + $0x28] sm:$0xff] }
  0xcf   : > { %964 = vperm.xlu0 %1887, %v930_v49   ;;  %v1740_v52 = vld [vmem:[%s2062_s19 + $0x38] sm:$0xff]  ;;  %974 = vperm.xlu1 %1888, %v932_v50   ;;  %v1739_v53 = vld [vmem:[%s2062_s19 + $0x30] sm:$0xff]  ;;  %v1738_v57 = vld [vmem:[%s2062_s19 + $0x28] sm:$0xff] }
  0xd0   : > { %1889 = vset.pattern.permute.xlu2 %v1916_v51  ;;  %830 = vmatpush.bf16.msra.mxu0 %v1740_v52  ;;  %v1737_v58 = vld [vmem:[%s2062_s19 + $0x20] sm:$0xff]  ;;  %v936_v60 = vld [vmem:[%s2003_s25 + $0x30] sm:$0xff]  ;;  %v937_v61 = vld [vmem:[%s2003_s25 + $0x38] sm:$0xff] }
  0xd1   : > { %1814 = vmatpush.bf16.msra.mxu1 %v1740_v52  ;;  %1815 = vmatpush.bf16.msra.mxu2 %v1740_v52  ;;  %v1736_v62 = vld [vmem:[%s2062_s19 + $0x18] sm:$0xff]  ;;  %v1735_v63 = vld [vmem:[%s2062_s19 + $0x10] sm:$0xff]  ;;  %v2077_v0 = vld [vmem:[%s1998_s22] sm:$0xff]  }
  0xd2   : > { %1816 = vmatpush.bf16.msra.mxu3 %v1740_v52  ;;  %984 = vperm.xlu2 %1889, %v934_v54   ;;  %v2080_v1 = vld [vmem:[%s1998_s22 + $0x8] sm:$0xff]   ;;  %v938_v2 = vld [vmem:[%s2003_s25 + $0x40] sm:$0xff]  ;;  %v2084_v3 = vld [vmem:[%s1998_s22 + $0x10] sm:$0xff]   ;;  %v1760_v6 = vunpack.c.0.s8 %v2077_v0  ;;  %v1761_v7 = vunpack.c.1.s8 %v2077_v0  ;;  %v1764_v34 = vunpack.c.2.s8 %v2077_v0  ;;  %v1765_v35 = vunpack.c.3.s8 %v2077_v0 }
  0xd3   : > { %v2087_v4 = vld [vmem:[%s1998_s22 + $0x18] sm:$0xff]   ;;  %v939_v5 = vld [vmem:[%s2003_s25 + $0x48] sm:$0xff]  ;;  %v1768_v8 = vunpack.c.0.s8 %v2080_v1  ;;  %v1769_v9 = vunpack.c.1.s8 %v2080_v1  ;;  %v940_v10 = vld [vmem:[%s2003_s25 + $0x50] sm:$0xff]  ;;  %v1776_v12 = vunpack.c.0.s8 %v2084_v3  ;;  %v1777_v13 = vunpack.c.1.s8 %v2084_v3 }
  0xd4   : > { %831 = vmatpush.bf16.msra.mxu0 %v1739_v53  ;;  %v1734_v11 = vld [vmem:[%s2062_s19 + $0x8] sm:$0xff]  ;;  %v1784_v14 = vunpack.c.0.s8 %v2087_v4  ;;  %v1785_v15 = vunpack.c.1.s8 %v2087_v4  ;;  %v758_v16 = vcvt.s32.f32 %v1760_v6  ;;  %v759_v17 = vcvt.s32.f32 %v1761_v7  ;;  %v1733_v20 = vld [vmem:[%s2062_s19] sm:$0xff]  ;;  %v941_v25 = vld [vmem:[%s2003_s25 + $0x58] sm:$0xff] }
  0xd5   : > { %1817 = vmatpush.bf16.msra.mxu1 %v1739_v53  ;;  %1818 = vmatpush.bf16.msra.mxu2 %v1739_v53  ;;  %v762_v18 = vcvt.s32.f32 %v1768_v8  ;;  %v763_v19 = vcvt.s32.f32 %v1769_v9  ;;  %v766_v21 = vcvt.s32.f32 %v1776_v12  ;;  %v767_v22 = vcvt.s32.f32 %v1777_v13  ;;  %v942_v26 = vld [vmem:[%s2003_s25 + $0x60] sm:$0xff]  ;;  %v943_v29 = vld [vmem:[%s2003_s25 + $0x68] sm:$0xff]  ;;  %v944_v32 = vld [vmem:[%s2003_s25 + $0x70] sm:$0xff] }
  0xd6   : > { %1819 = vmatpush.bf16.msra.mxu3 %v1739_v53  ;;  %v770_v23 = vcvt.s32.f32 %v1784_v14  ;;  %v771_v24 = vcvt.s32.f32 %v1785_v15  ;;  %v774_v27 = vpack.c.bf16 %v759_v17, %v758_v16  ;;  %v945_v33 = vld [vmem:[%s2003_s25 + $0x78] sm:$0xff]  ;;  %v1772_v36 = vunpack.c.2.s8 %v2080_v1  ;;  %v914_v0 = vld [vmem:[#allocation2 + $0x30] sm:$0xff]  ;;  %v926_v13 = vld [vmem:[#allocation2 + $0x60] sm:$0xff] }
  0xd7   : > { %969 = vperm.xlu0 %1887, %v931_v55   ;;  %979 = vperm.xlu1 %1888, %v933_v56   ;;  %v776_v28 = vpack.c.bf16 %v763_v19, %v762_v18  ;;  %v778_v30 = vpack.c.bf16 %v767_v22, %v766_v21  ;;  %v1773_v37 = vunpack.c.3.s8 %v2080_v1  ;;  %v1780_v38 = vunpack.c.2.s8 %v2084_v3  ;;  %v915_v17 = vld [vmem:[#allocation2] sm:$0xff]  ;;  %v919_v19 = vld [vmem:[#allocation2 + $0x68] sm:$0xff] }
  0xd8   : > { %832 = vmatpush.bf16.msra.mxu0 %v1738_v57  ;;  %v780_v31 = vpack.c.bf16 %v771_v24, %v770_v23  ;;  %v1781_v39 = vunpack.c.3.s8 %v2084_v3  ;;  %v1788_v40 = vunpack.c.2.s8 %v2087_v4  ;;  %v1789_v41 = vunpack.c.3.s8 %v2087_v4 }
  0xd9   : > { %1820 = vmatpush.bf16.msra.mxu1 %v1738_v57  ;;  %1821 = vmatpush.bf16.msra.mxu2 %v1738_v57  ;;  %v760_v42 = vcvt.s32.f32 %v1764_v34  ;;  %v761_v43 = vcvt.s32.f32 %v1765_v35  ;;  %v764_v44 = vcvt.s32.f32 %v1772_v36  ;;  %v765_v45 = vcvt.s32.f32 %v1773_v37  ;;  %v916_v35 = vld [vmem:[#allocation2 + $0x58] sm:$0xff]  ;;  %v920_v37 = vld [vmem:[#allocation2 + $0x8] sm:$0xff] }
  0xda   : > { %1822 = vmatpush.bf16.msra.mxu3 %v1738_v57  ;;  %989 = vperm.xlu2 %1889, %v935_v59   ;;  %v768_v46 = vcvt.s32.f32 %v1780_v38  ;;  %v769_v47 = vcvt.s32.f32 %v1781_v39  ;;  %v772_v48 = vcvt.s32.f32 %v1788_v40  ;;  %v773_v49 = vcvt.s32.f32 %v1789_v41 }
  0xdb   : > { %v775_v50 = vpack.c.bf16 %v761_v43, %v760_v42  ;;  %v777_v51 = vpack.c.bf16 %v765_v45, %v764_v44 }
  0xdc   : > { %833 = vmatpush.bf16.msra.mxu0 %v1737_v58  ;;  %v779_v52 = vpack.c.bf16 %v769_v47, %v768_v46  ;;  %v781_v53 = vpack.c.bf16 %v773_v49, %v772_v48  ;;  %v924_v46 = vld [vmem:[#allocation2 + $0x10] sm:$0xff]  ;;  %v928_v48 = vld [vmem:[#allocation2 + $0x78] sm:$0xff] }
  0xdd   : > { %1823 = vmatpush.bf16.msra.mxu1 %v1737_v58  ;;  %1824 = vmatpush.bf16.msra.mxu2 %v1737_v58 }
  0xde   : > { %1825 = vmatpush.bf16.msra.mxu3 %v1737_v58 }
  0xdf   : > { %994 = vperm.xlu0 %1887, %v936_v60   ;;  %999 = vperm.xlu1 %1888, %v937_v61  }
  0xe0   : > { %834 = vmatpush.bf16.msra.mxu0 %v1736_v62 }
  0xe1   : > { %1826 = vmatpush.bf16.msra.mxu1 %v1736_v62  ;;  %1827 = vmatpush.bf16.msra.mxu2 %v1736_v62 }
  0xe2   : > { %1828 = vmatpush.bf16.msra.mxu3 %v1736_v62  ;;  %1004 = vperm.xlu2 %1889, %v938_v2   ;;  %v918_v2 = vld [vmem:[#allocation2 + $0x50] sm:$0xff] }
  0xe4   : > { %835 = vmatpush.bf16.msra.mxu0 %v1735_v63 }
  0xe5   : > { %1829 = vmatpush.bf16.msra.mxu1 %v1735_v63  ;;  %1830 = vmatpush.bf16.msra.mxu2 %v1735_v63 }
  0xe6   : > { %1831 = vmatpush.bf16.msra.mxu3 %v1735_v63 }
  0xe7   : > { %1009 = vperm.xlu0 %1887, %v939_v5   ;;  %1014 = vperm.xlu1 %1888, %v940_v10  }
  0xe8   : > { %836 = vmatpush.bf16.msra.mxu0 %v1734_v11 }
  0xe9   : > { %1832 = vmatpush.bf16.msra.mxu1 %v1734_v11  ;;  %1833 = vmatpush.bf16.msra.mxu2 %v1734_v11 }
  0xea   : > { %1834 = vmatpush.bf16.msra.mxu3 %v1734_v11  ;;  %1019 = vperm.xlu2 %1889, %v941_v25   ;;  %v922_v11 = vld [vmem:[#allocation2 + $0x40] sm:$0xff] }
  0xec   : > { %837 = vmatpush.bf16.msra.mxu0 %v1733_v20 }
  0xed   : > { %1835 = vmatpush.bf16.msra.mxu1 %v1733_v20  ;;  %1836 = vmatpush.bf16.msra.mxu2 %v1733_v20 }
  0xee   : > { %1837 = vmatpush.bf16.msra.mxu3 %v1733_v20 }
  0xef   : > { %1024 = vperm.xlu0 %1887, %v942_v26   ;;  %1029 = vperm.xlu1 %1888, %v943_v29   ;;  %v923_v29 = vld [vmem:[#allocation2 + $0x20] sm:$0xff] }
  0xf0   : > { %838 = vmatmul.bf16.vlgmr.msra.gmra.mxu0 %v774_v27  ;;  %848 = vmatmul.bf16.vlgmr.msra.gmra.mxu1 %v776_v28 }
  0xf1   : > { %858 = vmatmul.bf16.vlgmr.msra.gmra.mxu2 %v778_v30  ;;  %868 = vmatmul.bf16.vlgmr.msra.gmra.mxu3 %v780_v31  ;;  %v927_v31 = vld [vmem:[#allocation2 + $0x70] sm:$0xff] }
  0xf2   : > { %1034 = vperm.xlu2 %1889, %v944_v32  }
  0xf7   : > { %1039 = vperm.xlu0 %1887, %v945_v33  }
 0x100   : > { %843 = vmatmul.bf16.gmra.mxu0 %v775_v50  ;;  %853 = vmatmul.bf16.gmra.mxu1 %v777_v51 }
 0x101   : > { %863 = vmatmul.bf16.gmra.mxu2 %v779_v52  ;;  %873 = vmatmul.bf16.gmra.mxu3 %v781_v53  ;;  %v917_v52 = vld [vmem:[#allocation2 + $0x18] sm:$0xff] }
 0x12c   : > { %v985_v57 = vpop.permute.xlu2 %984 }
 0x134   : > { %v990_v60 = vpop.permute.xlu2 %989 }
 0x13c   : > { %v1005_v5 = vpop.permute.xlu2 %1004 }
 0x141   : > { %v965_v54 = vpop.permute.xlu0 %964  ;;  %v975_v55 = vpop.permute.xlu1 %974 }
 0x144   : > { %v1020_v26 = vpop.permute.xlu2 %1019 }
 0x149   : > { %v970_v56 = vpop.permute.xlu0 %969  ;;  %v2115_v58 = vpop.permute.xlu1 %979 }
 0x14c   : > { %v1035_v44 = vpop.permute.xlu2 %1034 }
 0x151   : > { %v995_v59 = vpop.permute.xlu0 %994  ;;  %v2117_v61 = vpop.permute.xlu1 %999 }
 0x159   : > { %v1010_v62 = vpop.permute.xlu0 %1009  ;;  %v1015_v8 = vpop.permute.xlu1 %1014 }
 0x161   : > { %v1025_v9 = vpop.permute.xlu0 %1024  ;;  %v1030_v27 = vpop.permute.xlu1 %1029 }
 0x16d   : > { %v839_v63 = vpop.f32.mrf.mxu0  ;;  %v849_v1 = vpop.f32.mrf.mxu1 }
 0x16e   : > { %v1042_v3 = vmul.f32 %v965_v54, %v839_v63  ;;  %v1046_v4 = vmul.f32 %v985_v57, %v849_v1  ;;  %v921_v54 = vld [vmem:[#allocation2 + $0x48] sm:$0xff]  ;;  %v1040_v63 = vpop.permute.xlu0 %1039  ;;  %v925_v1 = vld [vmem:[#allocation2 + $0x38] sm:$0xff] }
 0x170   : > { %v1058_v6 = vadd.f32 %v1042_v3, %v914_v0  ;;  %v1062_v7 = vadd.f32 %v1046_v4, %v918_v2  ;;  %v929_v3 = vld [vmem:[#allocation2 + $0x28] sm:$0xff] }
 0x172   : > { %1074 = vst [vmem:[#allocation2 + $0x30] sm:$0xff] %v1058_v6 }
 0x173   : > { %1078 = vst [vmem:[#allocation2 + $0x50] sm:$0xff] %v1062_v7 }
 0x174   : > { %v859_v10 = vpop.f32.mrf.mxu2  ;;  %v869_v12 = vpop.f32.mrf.mxu3 }
 0x175   : > { %v1050_v14 = vmul.f32 %v1005_v5, %v859_v10  ;;  %v1054_v15 = vmul.f32 %v1025_v9, %v869_v12  ;;  %v841_v16 = vpop.f32.mrf.mxu0  ;;  %v851_v18 = vpop.f32.mrf.mxu1  ;;  %v1746_v9 = vld [vmem:[%s2258_s6 + $0x20] sm:$0xff] (%p1090_p6)  ;;  %v1745_v10 = vld [vmem:[%s2258_s6 + $0x18] sm:$0xff] (%p1090_p6)  ;;  %v1743_v12 = vld [vmem:[%s2258_s6 + $0x8] sm:$0xff] (%p1090_p6) }
 0x176   : > { %v1043_v20 = vmul.f32 %v970_v56, %v841_v16  ;;  %v1047_v21 = vmul.f32 %v990_v60, %v851_v18 }
 0x177   : > { %v1066_v22 = vadd.f32 %v1050_v14, %v922_v11  ;;  %v1070_v23 = vadd.f32 %v1054_v15, %v926_v13  ;;  %v1744_v11 = vld [vmem:[%s2258_s6 + $0x10] sm:$0xff] (%p1090_p6)  ;;  %v1742_v13 = vld [vmem:[%s2258_s6] sm:$0xff] (%p1090_p6) }
 0x178   : > { %v1059_v24 = vadd.f32 %v1043_v20, %v915_v17  ;;  %v1063_v25 = vadd.f32 %v1047_v21, %v919_v19 }
 0x179   : > { %1082 = vst [vmem:[#allocation2 + $0x40] sm:$0xff] %v1066_v22  ;;  %v1095_v14 = vld [vmem:[#allocation2 + $0x30] sm:$0xff] (%p1090_p6) }
 0x17a   : > { %1086 = vst [vmem:[#allocation2 + $0x60] sm:$0xff] %v1070_v23 }
 0x17b   : > { %1075 = vst [vmem:[#allocation2] sm:$0xff] %v1059_v24 }
 0x17c   : > { %1079 = vst [vmem:[#allocation2 + $0x68] sm:$0xff] %v1063_v25  ;;  %v861_v28 = vpop.f32.mrf.mxu2  ;;  %v871_v30 = vpop.f32.mrf.mxu3 }
 0x17d   : > { %v1051_v32 = vmul.f32 %v1010_v62, %v861_v28  ;;  %v1055_v33 = vmul.f32 %v1030_v27, %v871_v30  ;;  %v844_v34 = vpop.f32.mrf.mxu0  ;;  %v854_v36 = vpop.f32.mrf.mxu1  ;;  %v1756_v27 = vld [vmem:[%s2260_s8 + $0x30] sm:$0xff] (%p1090_p6)  ;;  %v1755_v28 = vld [vmem:[%s2260_s8 + $0x28] sm:$0xff] (%p1090_p6) }
 0x17e   : > { %v1044_v38 = vmul.f32 %v975_v55, %v844_v34  ;;  %v1048_v39 = vmul.f32 %v995_v59, %v854_v36 }
 0x17f   : > { %v1067_v40 = vadd.f32 %v1051_v32, %v923_v29  ;;  %v1071_v41 = vadd.f32 %v1055_v33, %v927_v31  ;;  %v1099_v29 = vld [vmem:[#allocation2 + $0x50] sm:$0xff] (%p1090_p6)  ;;  %v1754_v33 = vld [vmem:[%s2260_s8 + $0x20] sm:$0xff] (%p1090_p6) }
 0x180   : > { %v1060_v42 = vadd.f32 %v1044_v38, %v916_v35  ;;  %v1064_v43 = vadd.f32 %v1048_v39, %v920_v37  ;;  %v1103_v16 = vld [vmem:[#allocation2 + $0x40] sm:$0xff] (%p1090_p6) }
 0x181   : > { %1083 = vst [vmem:[#allocation2 + $0x20] sm:$0xff] %v1067_v40  ;;  %v1107_v31 = vld [vmem:[#allocation2 + $0x60] sm:$0xff] (%p1090_p6) }
 0x182   : > { %1087 = vst [vmem:[#allocation2 + $0x70] sm:$0xff] %v1071_v41  ;;  %v1096_v15 = vld [vmem:[#allocation2] sm:$0xff] (%p1090_p6) }
 0x183   : > { %1076 = vst [vmem:[#allocation2 + $0x58] sm:$0xff] %v1060_v42  ;;  %v1111_v18 = vpack.c.bf16 (%p1090_p6), %v1096_v15, %v1095_v14  ;;  %v1100_v30 = vld [vmem:[#allocation2 + $0x68] sm:$0xff] (%p1090_p6)  ;;  %v1753_v42 = vld [vmem:[%s2260_s8 + $0x18] sm:$0xff] (%p1090_p6) }
 0x184   : > { %1080 = vst [vmem:[#allocation2 + $0x8] sm:$0xff] %v1064_v43  ;;  %v864_v45 = vpop.f32.mrf.mxu2  ;;  %v874_v47 = vpop.f32.mrf.mxu3  ;;  %v1113_v34 = vpack.c.bf16 (%p1090_p6), %v1100_v30, %v1099_v29  ;;  %v1752_v43 = vld [vmem:[%s2260_s8 + $0x10] sm:$0xff] (%p1090_p6) }
 0x185   : > { %v1052_v49 = vmul.f32 %v1015_v8, %v864_v45  ;;  %v1056_v50 = vmul.f32 %v1035_v44, %v874_v47  ;;  %v846_v51 = vpop.f32.mrf.mxu0  ;;  %v856_v53 = vpop.f32.mrf.mxu1  ;;  %v1747_v8 = vld [vmem:[%s2258_s6 + $0x28] sm:$0xff] (%p1090_p6)  ;;  %v1750_v45 = vld [vmem:[%s2260_s8] sm:$0xff] (%p1090_p6) }
 0x186   : > { %v1045_v55 = vmul.f32 %v2115_v58, %v846_v51  ;;  %v1049_v56 = vmul.f32 %v2117_v61, %v856_v53  ;;  %v1749_v58 = vld [vmem:[%s2258_s6 + $0x38] sm:$0xff] (%p1090_p6)  ;;  %v1748_v61 = vld [vmem:[%s2258_s6 + $0x30] sm:$0xff] (%p1090_p6)  ;;  %v1751_v44 = vld [vmem:[%s2260_s8 + $0x8] sm:$0xff] (%p1090_p6) }
 0x187   : > { %v1068_v57 = vadd.f32 %v1052_v49, %v924_v46  ;;  %v1072_v59 = vadd.f32 %v1056_v50, %v928_v48  ;;  %1187 = vmatpush.bf16.msra.mxu0 (%p1090_p6), %v1749_v58  ;;  %1838 = vmatpush.bf16.msra.mxu2 (%p1090_p6), %v1749_v58  ;;  %v2174_v47 = vld [vmem:[%s2259_s7] ss:$0 sm:$0xff] (%p1090_p6) }
 0x188   : > { %v1061_v60 = vadd.f32 %v1045_v55, %v917_v52  ;;  %v1065_v62 = vadd.f32 %v1049_v56, %v921_v54  ;;  %v1104_v17 = vld [vmem:[#allocation2 + $0x20] sm:$0xff] (%p1090_p6) }
 0x189   : > { %1084 = vst [vmem:[#allocation2 + $0x10] sm:$0xff] %v1068_v57  ;;  %v1115_v19 = vpack.c.bf16 (%p1090_p6), %v1104_v17, %v1103_v16  ;;  %v1108_v32 = vld [vmem:[#allocation2 + $0x70] sm:$0xff] (%p1090_p6) }
 0x18a   : > { %1088 = vst [vmem:[#allocation2 + $0x78] sm:$0xff] %v1072_v59  ;;  %v1097_v20 = vld [vmem:[#allocation2 + $0x58] sm:$0xff] (%p1090_p6)  ;;  %v1117_v35 = vpack.c.bf16 (%p1090_p6), %v1108_v32, %v1107_v31 }
 0x18b   : > { %1077 = vst [vmem:[#allocation2 + $0x18] sm:$0xff] %v1061_v60  ;;  %1188 = vmatpush.bf16.msra.mxu0 (%p1090_p6), %v1748_v61  ;;  %1839 = vmatpush.bf16.msra.mxu2 (%p1090_p6), %v1748_v61  ;;  %v1101_v36 = vld [vmem:[#allocation2 + $0x8] sm:$0xff] (%p1090_p6) }
 0x18c   : > { %1081 = vst [vmem:[#allocation2 + $0x48] sm:$0xff] %v1065_v62  ;;  %v866_v0 = vpop.f32.mrf.mxu2  ;;  %v876_v2 = vpop.f32.mrf.mxu3 }
 0x18d   : > { %v1053_v4 = vmul.f32 %v1020_v26, %v866_v0  ;;  %v1057_v5 = vmul.f32 %v1040_v63, %v876_v2  ;;  %v1757_v26 = vld [vmem:[%s2260_s8 + $0x38] sm:$0xff] (%p1090_p6) }
 0x18e   : > { %1094 = sbr.rel (!%p1090_p6) target bundleno = 760 (0x2f8), region = 76  ;;  %1360 = vmatpush.bf16.msra.mxu1 (%p1090_p6), %v1757_v26  ;;  %1846 = vmatpush.bf16.msra.mxu3 (%p1090_p6), %v1757_v26 }
 0x18f   : > { %v1069_v6 = vadd.f32 %v1053_v4, %v925_v1  ;;  %v1073_v7 = vadd.f32 %v1057_v5, %v929_v3  ;;  %1189 = vmatpush.bf16.msra.mxu0 (%p1090_p6), %v1747_v8  ;;  %1840 = vmatpush.bf16.msra.mxu2 (%p1090_p6), %v1747_v8 }
 0x190   : > { %v1105_v22 = vld [vmem:[#allocation2 + $0x10] sm:$0xff] (%p1090_p6) }
 0x191   : > { %1085 = vst [vmem:[#allocation2 + $0x38] sm:$0xff] %v1069_v6  ;;  %v1109_v38 = vld [vmem:[#allocation2 + $0x78] sm:$0xff] (%p1090_p6) }
 0x192   : > { %1089 = vst [vmem:[#allocation2 + $0x28] sm:$0xff] %v1073_v7  ;;  %v1098_v21 = vld [vmem:[#allocation2 + $0x18] sm:$0xff] (%p1090_p6)  ;;  %1361 = vmatpush.bf16.msra.mxu1 (%p1090_p6), %v1756_v27  ;;  %1847 = vmatpush.bf16.msra.mxu3 (%p1090_p6), %v1756_v27 }
 0x193   : > { %1190 = vmatpush.bf16.msra.mxu0 %v1746_v9  ;;  %1841 = vmatpush.bf16.msra.mxu2 %v1746_v9  ;;  %v1112_v24 = vpack.c.bf16 %v1098_v21, %v1097_v20  ;;  %v1102_v37 = vld [vmem:[#allocation2 + $0x48] sm:$0xff] }
 0x194   : > { %v1114_v40 = vpack.c.bf16 %v1102_v37, %v1101_v36 }
 0x196   : > { %1362 = vmatpush.bf16.msra.mxu1 %v1755_v28  ;;  %1848 = vmatpush.bf16.msra.mxu3 %v1755_v28 }
 0x197   : > { %1191 = vmatpush.bf16.msra.mxu0 %v1745_v10  ;;  %1842 = vmatpush.bf16.msra.mxu2 %v1745_v10 }
 0x198   : > { %v1106_v23 = vld [vmem:[#allocation2 + $0x38] sm:$0xff] }
 0x199   : > { %v1116_v25 = vpack.c.bf16 %v1106_v23, %v1105_v22  ;;  %v1110_v39 = vld [vmem:[#allocation2 + $0x28] sm:$0xff] }
 0x19a   : > { %1363 = vmatpush.bf16.msra.mxu1 %v1754_v33  ;;  %1849 = vmatpush.bf16.msra.mxu3 %v1754_v33  ;;  %v1118_v41 = vpack.c.bf16 %v1110_v39, %v1109_v38 }
 0x19b   : > { %1192 = vmatpush.bf16.msra.mxu0 %v1744_v11  ;;  %1843 = vmatpush.bf16.msra.mxu2 %v1744_v11 }
 0x19e   : > { %1364 = vmatpush.bf16.msra.mxu1 %v1753_v42  ;;  %1850 = vmatpush.bf16.msra.mxu3 %v1753_v42 }
 0x19f   : > { %1193 = vmatpush.bf16.msra.mxu0 %v1743_v12  ;;  %1844 = vmatpush.bf16.msra.mxu2 %v1743_v12 }
 0x1a2   : > { %1365 = vmatpush.bf16.msra.mxu1 %v1752_v43  ;;  %1851 = vmatpush.bf16.msra.mxu3 %v1752_v43 }
 0x1a3   : > { %1194 = vmatpush.bf16.msra.mxu0 %v1742_v13  ;;  %1845 = vmatpush.bf16.msra.mxu2 %v1742_v13 }
 0x1a6   : > { %1195 = vmatmul.bf16.vlgmr.msra.gmra.mxu0 %v1111_v18  ;;  %1215 = vmatmul.bf16.vlgmr.msra.gmra.mxu2 %v1115_v19 }
 0x1a7   : > { %1366 = vmatpush.bf16.msra.mxu1 %v1751_v44  ;;  %1852 = vmatpush.bf16.msra.mxu3 %v1751_v44 }
 0x1ab   : > { %1367 = vmatpush.bf16.msra.mxu1 %v1750_v45  ;;  %1853 = vmatpush.bf16.msra.mxu3 %v1750_v45 }
 0x1b6   : > { %1200 = vmatmul.bf16.gmra.mxu0 %v1112_v24  ;;  %1220 = vmatmul.bf16.gmra.mxu2 %v1116_v25 }
 0x1c6   : > { %1205 = vmatmul.bf16.gmra.mxu0 %v1113_v34  ;;  %1225 = vmatmul.bf16.gmra.mxu2 %v1117_v35 }
 0x1d6   : > { %1210 = vmatmul.bf16.gmra.mxu0 %v1114_v40  ;;  %1230 = vmatmul.bf16.gmra.mxu2 %v1118_v41 }
 0x223   : > { %v1196_v46 = vpop.f32.mrf.mxu0 }
 0x224   : > { %v1197_v48 = vadd.f32 %v2174_v47, %v1196_v46 }
 0x226   : > { %v1252_v50 = vmul.f32 0.01, %v1197_v48  ;;  %vm1236_vm0 = vcmp.gt.f32.partialorder %v1197_v48, 0.0 }
 0x228   : > { %v1268_v55 = vsel %vm1236_vm0, %v1197_v48, %v1252_v50 }
 0x229   : > { %v1216_v49 = vpop.f32.mrf.mxu2 }
 0x22a   : > { %v1217_v53 = vadd.f32 %v2174_v47, %v1216_v49 }
 0x22b   : > { %v1198_v51 = vpop.f32.mrf.mxu0 }
 0x22c   : > { %v1199_v52 = vadd.f32 %v2174_v47, %v1198_v51  ;;  %v1260_v60 = vmul.f32 0.01, %v1217_v53  ;;  %vm1244_vm2 = vcmp.gt.f32.partialorder %v1217_v53, 0.0 }
 0x22e   : > { %v1253_v54 = vmul.f32 0.01, %v1199_v52  ;;  %vm1237_vm1 = vcmp.gt.f32.partialorder %v1199_v52, 0.0  ;;  %v1276_v2 = vsel %vm1244_vm2, %v1217_v53, %v1260_v60 }
 0x230   : > { %v1269_v56 = vsel %vm1237_vm1, %v1199_v52, %v1253_v54 }
 0x231   : > { %v1218_v57 = vpop.f32.mrf.mxu2  ;;  %v1284_v59 = vpack.c.bf16 %v1269_v56, %v1268_v55  ;;  %v1891_v56 = vld [vmem:[%s2261_s9] ss:$0 sm:$0xff] }
 0x232   : > { %v1219_v62 = vadd.f32 %v2174_v47, %v1218_v57 }
 0x233   : > { %v1201_v63 = vpop.f32.mrf.mxu0  ;;  %1368 = vmatmul.bf16.vlgmr.msra.gmra.mxu1 %v1284_v59 }
 0x234   : > { %v1261_v0 = vmul.f32 0.01, %v1219_v62  ;;  %vm1245_vm3 = vcmp.gt.f32.partialorder %v1219_v62, 0.0  ;;  %v1202_v1 = vadd.f32 %v2174_v47, %v1201_v63 }
 0x236   : > { %v1277_v3 = vsel %vm1245_vm3, %v1219_v62, %v1261_v0  ;;  %v1254_v6 = vmul.f32 0.01, %v1202_v1  ;;  %vm1238_vm4 = vcmp.gt.f32.partialorder %v1202_v1, 0.0 }
 0x237   : > { %v1288_v4 = vpack.c.bf16 %v1277_v3, %v1276_v2 }
 0x238   : > { %v1270_v9 = vsel %vm1238_vm4, %v1202_v1, %v1254_v6 }
 0x239   : > { %v1221_v5 = vpop.f32.mrf.mxu2  ;;  %1388 = vmatmul.bf16.vlgmr.msra.gmra.mxu3 %v1288_v4 }
 0x23a   : > { %v1222_v61 = vadd.f32 %v2174_v47, %v1221_v5 }
 0x23b   : > { %v1203_v7 = vpop.f32.mrf.mxu0 }
 0x23c   : > { %v1204_v58 = vadd.f32 %v2174_v47, %v1203_v7  ;;  %v1262_v13 = vmul.f32 0.01, %v1222_v61  ;;  %vm1246_vm6 = vcmp.gt.f32.partialorder %v1222_v61, 0.0 }
 0x23e   : > { %v1255_v8 = vmul.f32 0.01, %v1204_v58  ;;  %vm1239_vm5 = vcmp.gt.f32.partialorder %v1204_v58, 0.0  ;;  %v1278_v18 = vsel %vm1246_vm6, %v1222_v61, %v1262_v13 }
 0x240   : > { %v1271_v10 = vsel %vm1239_vm5, %v1204_v58, %v1255_v8 }
 0x241   : > { %v1223_v11 = vpop.f32.mrf.mxu2  ;;  %v1285_v12 = vpack.c.bf16 %v1271_v10, %v1270_v9 }
 0x242   : > { %v1224_v14 = vadd.f32 %v2174_v47, %v1223_v11 }
 0x243   : > { %v1206_v15 = vpop.f32.mrf.mxu0  ;;  %1373 = vmatmul.bf16.gmra.mxu1 %v1285_v12 }
 0x244   : > { %v1263_v16 = vmul.f32 0.01, %v1224_v14  ;;  %vm1247_vm7 = vcmp.gt.f32.partialorder %v1224_v14, 0.0  ;;  %v1207_v17 = vadd.f32 %v2174_v47, %v1206_v15 }
 0x246   : > { %v1279_v19 = vsel %vm1247_vm7, %v1224_v14, %v1263_v16  ;;  %v1256_v22 = vmul.f32 0.01, %v1207_v17  ;;  %vm1240_vm8 = vcmp.gt.f32.partialorder %v1207_v17, 0.0 }
 0x247   : > { %v1289_v20 = vpack.c.bf16 %v1279_v19, %v1278_v18 }
 0x248   : > { %v1272_v27 = vsel %vm1240_vm8, %v1207_v17, %v1256_v22 }
 0x249   : > { %v1226_v21 = vpop.f32.mrf.mxu2  ;;  %1393 = vmatmul.bf16.gmra.mxu3 %v1289_v20 }
 0x24a   : > { %v1227_v25 = vadd.f32 %v2174_v47, %v1226_v21 }
 0x24b   : > { %v1208_v23 = vpop.f32.mrf.mxu0 }
 0x24c   : > { %v1209_v24 = vadd.f32 %v2174_v47, %v1208_v23  ;;  %v1264_v31 = vmul.f32 0.01, %v1227_v25  ;;  %vm1248_vm10 = vcmp.gt.f32.partialorder %v1227_v25, 0.0 }
 0x24e   : > { %v1257_v26 = vmul.f32 0.01, %v1209_v24  ;;  %vm1241_vm9 = vcmp.gt.f32.partialorder %v1209_v24, 0.0  ;;  %v1280_v36 = vsel %vm1248_vm10, %v1227_v25, %v1264_v31 }
 0x250   : > { %v1273_v28 = vsel %vm1241_vm9, %v1209_v24, %v1257_v26 }
 0x251   : > { %v1228_v29 = vpop.f32.mrf.mxu2  ;;  %v1286_v30 = vpack.c.bf16 %v1273_v28, %v1272_v27 }
 0x252   : > { %v1229_v32 = vadd.f32 %v2174_v47, %v1228_v29 }
 0x253   : > { %v1211_v33 = vpop.f32.mrf.mxu0  ;;  %1378 = vmatmul.bf16.gmra.mxu1 %v1286_v30 }
 0x254   : > { %v1265_v34 = vmul.f32 0.01, %v1229_v32  ;;  %vm1249_vm11 = vcmp.gt.f32.partialorder %v1229_v32, 0.0  ;;  %v1212_v35 = vadd.f32 %v2174_v47, %v1211_v33 }
 0x256   : > { %v1281_v37 = vsel %vm1249_vm11, %v1229_v32, %v1265_v34  ;;  %v1258_v40 = vmul.f32 0.01, %v1212_v35  ;;  %vm1242_vm12 = vcmp.gt.f32.partialorder %v1212_v35, 0.0 }
 0x257   : > { %v1290_v38 = vpack.c.bf16 %v1281_v37, %v1280_v36 }
 0x258   : > { %v1274_v45 = vsel %vm1242_vm12, %v1212_v35, %v1258_v40 }
 0x259   : > { %v1231_v39 = vpop.f32.mrf.mxu2  ;;  %1398 = vmatmul.bf16.gmra.mxu3 %v1290_v38 }
 0x25a   : > { %v1232_v43 = vadd.f32 %v2174_v47, %v1231_v39 }
 0x25b   : > { %v1213_v41 = vpop.f32.mrf.mxu0 }
 0x25c   : > { %v1214_v42 = vadd.f32 %v2174_v47, %v1213_v41  ;;  %v1266_v50 = vmul.f32 0.01, %v1232_v43  ;;  %vm1250_vm14 = vcmp.gt.f32.partialorder %v1232_v43, 0.0 }
 0x25e   : > { %v1259_v44 = vmul.f32 0.01, %v1214_v42  ;;  %vm1243_vm13 = vcmp.gt.f32.partialorder %v1214_v42, 0.0  ;;  %v1282_v53 = vsel %vm1250_vm14, %v1232_v43, %v1266_v50 }
 0x260   : > { %v1275_v46 = vsel %vm1243_vm13, %v1214_v42, %v1259_v44 }
 0x261   : > { %v1233_v48 = vpop.f32.mrf.mxu2  ;;  %v1287_v49 = vpack.c.bf16 %v1275_v46, %v1274_v45 }
 0x262   : > { %v1234_v51 = vadd.f32 %v2174_v47, %v1233_v48 }
 0x263   : > { %1383 = vmatmul.bf16.gmra.mxu1 %v1287_v49 }
 0x264   : > { %v1267_v52 = vmul.f32 0.01, %v1234_v51  ;;  %vm1251_vm15 = vcmp.gt.f32.partialorder %v1234_v51, 0.0 }
 0x266   : > { %v1283_v54 = vsel %vm1251_vm15, %v1234_v51, %v1267_v52 }
 0x267   : > { %v1291_v55 = vpack.c.bf16 %v1283_v54, %v1282_v53 }
 0x269   : > { %1403 = vmatmul.bf16.gmra.mxu3 %v1291_v55 }
 0x2b0   : > { %v1369_v57 = vpop.f32.mrf.mxu1 }
 0x2b1   : > { %v1370_v59 = vadd.f32 %v1891_v56, %v1369_v57 }
 0x2b3   : > { %1409 = vst [vmem:[%s2262_s10] sm:$0xff] %v1370_v59 }
 0x2b8   : > { %v1371_v60 = vpop.f32.mrf.mxu1 }
 0x2b9   : > { %v1372_v47 = vadd.f32 %v1891_v56, %v1371_v60 }
 0x2bb   : > { %1410 = vst [vmem:[%s2262_s10 + $0x8] sm:$0xff] %v1372_v47 }
 0x2bc   : > { %v1389_v62 = vpop.f32.mrf.mxu3 }
 0x2bd   : > { %v1390_v63 = vadd.f32 %v1891_v56, %v1389_v62 }
 0x2bf   : > { %1417 = vst [vmem:[%s2262_s10 + $0x40] sm:$0xff] %v1390_v63 }
 0x2c0   : > { %v1374_v0 = vpop.f32.mrf.mxu1 }
 0x2c1   : > { %v1375_v1 = vadd.f32 %v1891_v56, %v1374_v0 }
 0x2c3   : > { %1411 = vst [vmem:[%s2262_s10 + $0x10] sm:$0xff] %v1375_v1 }
 0x2c4   : > { %v1391_v2 = vpop.f32.mrf.mxu3 }
 0x2c5   : > { %v1392_v3 = vadd.f32 %v1891_v56, %v1391_v2 }
 0x2c7   : > { %1418 = vst [vmem:[%s2262_s10 + $0x48] sm:$0xff] %v1392_v3 }
 0x2c8   : > { %v1376_v4 = vpop.f32.mrf.mxu1 }
 0x2c9   : > { %v1377_v5 = vadd.f32 %v1891_v56, %v1376_v4 }
 0x2cb   : > { %1412 = vst [vmem:[%s2262_s10 + $0x18] sm:$0xff] %v1377_v5 }
 0x2cc   : > { %v1394_v6 = vpop.f32.mrf.mxu3 }
 0x2cd   : > { %v1395_v7 = vadd.f32 %v1891_v56, %v1394_v6 }
 0x2cf   : > { %1419 = vst [vmem:[%s2262_s10 + $0x50] sm:$0xff] %v1395_v7 }
 0x2d0   : > { %v1379_v58 = vpop.f32.mrf.mxu1 }
 0x2d1   : > { %v1380_v61 = vadd.f32 %v1891_v56, %v1379_v58 }
 0x2d3   : > { %1413 = vst [vmem:[%s2262_s10 + $0x20] sm:$0xff] %v1380_v61 }
 0x2d4   : > { %v1396_v8 = vpop.f32.mrf.mxu3 }
 0x2d5   : > { %v1397_v9 = vadd.f32 %v1891_v56, %v1396_v8 }
 0x2d7   : > { %1420 = vst [vmem:[%s2262_s10 + $0x58] sm:$0xff] %v1397_v9 }
 0x2d8   : > { %v1381_v10 = vpop.f32.mrf.mxu1 }
 0x2d9   : > { %v1382_v11 = vadd.f32 %v1891_v56, %v1381_v10 }
 0x2db   : > { %1414 = vst [vmem:[%s2262_s10 + $0x28] sm:$0xff] %v1382_v11 }
 0x2dc   : > { %v1399_v12 = vpop.f32.mrf.mxu3 }
 0x2dd   : > { %v1400_v13 = vadd.f32 %v1891_v56, %v1399_v12 }
 0x2df   : > { %1421 = vst [vmem:[%s2262_s10 + $0x60] sm:$0xff] %v1400_v13 }
 0x2e0   : > { %v1384_v14 = vpop.f32.mrf.mxu1 }
 0x2e1   : > { %v1385_v15 = vadd.f32 %v1891_v56, %v1384_v14 }
 0x2e3   : > { %1415 = vst [vmem:[%s2262_s10 + $0x30] sm:$0xff] %v1385_v15 }
 0x2e4   : > { %v1401_v16 = vpop.f32.mrf.mxu3 }
 0x2e5   : > { %v1402_v17 = vadd.f32 %v1891_v56, %v1401_v16 }
 0x2e7   : > { %1422 = vst [vmem:[%s2262_s10 + $0x68] sm:$0xff] %v1402_v17 }
 0x2e8   : > { %v1386_v18 = vpop.f32.mrf.mxu1 }
 0x2e9   : > { %v1387_v19 = vadd.f32 %v1891_v56, %v1386_v18 }
 0x2eb   : > { %1416 = vst [vmem:[%s2262_s10 + $0x38] sm:$0xff] %v1387_v19 }
 0x2ec   : > { %v1404_v20 = vpop.f32.mrf.mxu3 }
 0x2ed   : > { %v1405_v21 = vadd.f32 %v1891_v56, %v1404_v20 }
 0x2ef   : > { %1423 = vst [vmem:[%s2262_s10 + $0x70] sm:$0xff] %v1405_v21 }
 0x2f4   : > { %v1406_v22 = vpop.f32.mrf.mxu3 }
 0x2f5   : > { %v1407_v23 = vadd.f32 %v1891_v56, %v1406_v22 }
 0x2f7   : > { %1424 = vst [vmem:[%s2262_s10 + $0x78] sm:$0xff] %v1407_v23 }
 0x2f8 PF: > { %s20_s15 = sadd.s32 1, %s1914_s15   ;;  %s2263_s13 = smov %s1910_s14 }
 0x2f9   : > { %p17_p7 = scmp.ge.s32.totalorder %s20_s15, 4   ;;  %s2264_s14 = smov %s2266_s16 }
 0x2fb   :  { %19 = sbr.rel (!%p17_p7) target bundleno = 2 (0x2), region = 113 }

</bundles_post_ra>
